<compile_context>
chip_gen: v7x
topology: tpu7x:2x2x1
jax: 0.10.0
libtpu: 0.0.40
codegen_flags: <defaults>
</compile_context>

<pallas_src>
import functools

import jax
import jax.numpy as jnp
from jax import lax
from jax.experimental import pallas as pl
from jax.experimental.pallas import tpu as pltpu

D_MODEL = 768      # BERT hidden size (input_size of the LSTM)
HIDDEN = 128       # LSTM hidden size (bidirectional -> 256 pooled features)
VOCAB = 64         # synthetic vocab for the deterministic BERT stand-in


def lstm_kernel(gates_f_ref,    # (TS, TB, 4H) bf16  forward pre-activations slab
                whh_ref,        # (H, 4H)      bf16  recurrent weights [i,f,o,g]
                gates_b_ref,    # (TB, 4H)     f32   backward pre-activations @ t=S-1
                wfc_f_ref,      # (1, H)       f32   fc weights (forward half)
                wfc_b_ref,      # (1, H)       f32   fc weights (backward half)
                bfc_ref,        # (1, 1)       f32   fc bias
                out_ref,        # (TB, 1)      f32
                h_sc, c_sc,     # VMEM scratch (TB, H) f32, carried across seq axis
                *, seq_len):
    TS = gates_f_ref.shape[0]
    H = whh_ref.shape[0]

    @pl.when(pl.program_id(1) == 0)
    def _():
        h_sc[...] = jnp.zeros_like(h_sc)
        c_sc[...] = jnp.zeros_like(c_sc)

    t0 = pl.program_id(1) * TS

    def gate_split(gates):
        # Wrapper reorders PyTorch's [i, f, g, o] columns to [i, f, o, g] so a
        # single 3H-wide sigmoid + one tanh cover all four gates (EUP is on the
        # serial per-step critical path).
        sig = jax.nn.sigmoid(gates[:, :3 * H])
        i_g = sig[:, 0 * H:1 * H]
        f_g = sig[:, 1 * H:2 * H]
        o_g = sig[:, 2 * H:3 * H]
        g_g = jnp.tanh(gates[:, 3 * H:])
        return i_g, f_g, o_g, g_g

    def step(t, carry):
        h, c = carry
        # bf16 MXU matmul with f32 accumulation.  W_hh is read from VMEM inside
        # the loop (cheap vld) instead of pinned in vregs across the whole scan.
        # TODO(synk): explicit RHS staging via pltpu.matmul_push_rhs/acc_lhs/pop
        # deferred until a bundle dump confirms Mosaic re-pushes W_hh per step.
        rec = jnp.dot(h.astype(jnp.bfloat16), whh_ref[...],
                      preferred_element_type=jnp.float32)
        gates = gates_f_ref[t].astype(jnp.float32) + rec
        i_g, f_g, o_g, g_g = gate_split(gates)
        c_new = f_g * c + i_g * g_g
        h_new = o_g * jnp.tanh(c_new)
        # Mask trailing padded timesteps (S padded up to a multiple of TS).
        valid = (t0 + t) < seq_len
        h = jnp.where(valid, h_new, h)
        c = jnp.where(valid, c_new, c)
        return h, c

    h, c = lax.fori_loop(0, TS, step, (h_sc[...], c_sc[...]),
                         unroll=min(TS, 8))
    h_sc[...] = h
    c_sc[...] = c

    @pl.when(pl.program_id(1) == pl.num_programs(1) - 1)
    def _():
        # Backward direction at the last position == first step of the reverse
        # scan from zero state: h @ W_hh_b vanishes, f * c0 vanishes.
        gb = gates_b_ref[...]
        i_b, _, o_b, g_b = gate_split(gb)
        h_bwd = o_b * jnp.tanh(i_b * g_b)

        # TODO(synk): nn.Dropout(0.3) is identity at inference time; training-
        # mode random masking is not implemented here.

        # fc(concat([h_fwd, h_bwd])) as VPU mul + lane reduction (concat-free,
        # avoids a width-1 MXU matmul).
        logits = (jnp.sum(h * wfc_f_ref[...], axis=-1, keepdims=True)
                  + jnp.sum(h_bwd * wfc_b_ref[...], axis=-1, keepdims=True)
                  + bfc_ref[...])
        out_ref[...] = jax.nn.sigmoid(logits)


def _reorder_gate_cols(w):
    # PyTorch gate column groups [i | f | g | o]  ->  [i | f | o | g]
    return jnp.concatenate(
        [w[..., :2 * HIDDEN], w[..., 3 * HIDDEN:], w[..., 2 * HIDDEN:3 * HIDDEN]],
        axis=-1)


def init_params(key):
    ks = jax.random.split(key, 11)
    s = 1.0 / (HIDDEN ** 0.5)
    sf = 1.0 / ((2 * HIDDEN) ** 0.5)

    def u(k, shape, scale):
        return jax.random.uniform(k, shape, jnp.float32, -scale, scale)

    return {
        # deterministic stand-in "BERT" token embedding table
        "embedding": jax.random.normal(ks[0], (VOCAB, D_MODEL), jnp.float32) * 0.02,
        # forward LSTM direction (weights stored as (in, 4H), gate order i,f,g,o)
        "wih_f": u(ks[1], (D_MODEL, 4 * HIDDEN), s),
        "whh_f": u(ks[2], (HIDDEN, 4 * HIDDEN), s),
        "b_f":   u(ks[3], (1, 4 * HIDDEN), s) + u(ks[4], (1, 4 * HIDDEN), s),   # b_ih + b_hh
        # backward LSTM direction (b_b also mirrors PyTorch's b_ih + b_hh sum)
        "wih_b": u(ks[5], (D_MODEL, 4 * HIDDEN), s),
        "whh_b": u(ks[6], (HIDDEN, 4 * HIDDEN), s),
        "b_b":   u(ks[7], (1, 4 * HIDDEN), s) + u(ks[8], (1, 4 * HIDDEN), s),
        # fc: Linear(256 -> 1), stored as (256, 1)
        "wfc":   u(ks[9], (2 * HIDDEN, 1), sf),
        "bfc":   u(ks[10], (1, 1), sf),
    }


def bert_lstm_forward(input_ids, attention_mask, params):
    B, S = input_ids.shape
    # TODO(synk): the pretrained 'bert-base-uncased' encoder has no clean Pallas
    # equivalent without its checkpoint; it is replaced by a deterministic
    # embedding lookup producing (B, S, 768) hidden states, with masked
    # positions zeroed by attention_mask.  The LSTM still advances over masked
    # positions (unpacked-sequence semantics, matching nn.LSTM on padded input).
    bert_out = params["embedding"][input_ids]                        # (B, S, 768)
    bert_out = bert_out * attention_mask[..., None].astype(bert_out.dtype)

    # Pad batch to the native 8-sublane tile (rows are independent, so padded
    # rows never perturb real rows); time-major layout for the recurrence.
    B_pad = max(8, ((B + 7) // 8) * 8)
    x = jnp.transpose(bert_out, (1, 0, 2))                           # (S, B, 768)
    if B_pad != B:
        x = jnp.pad(x, ((0, 0), (0, B_pad - B), (0, 0)))

    # Gate-column reorder [i,f,g,o] -> [i,f,o,g]; bf16 weights for MXU paths.
    wih_f = _reorder_gate_cols(params["wih_f"]).astype(jnp.bfloat16)
    whh_f = _reorder_gate_cols(params["whh_f"]).astype(jnp.bfloat16)
    b_f   = _reorder_gate_cols(params["b_f"])
    wih_b = _reorder_gate_cols(params["wih_b"])
    b_b   = _reorder_gate_cols(params["b_b"])

    # Hoisted input projection (dominant FLOPs of the whole model): bf16 x bf16
    # -> f32, bias folded in, then the streamed slab emitted as bf16 to halve
    # HBM traffic and the double-buffered VMEM footprint.
    gates_in_f = (jnp.dot(x.astype(jnp.bfloat16).reshape(S * B_pad, D_MODEL),
                          wih_f, preferred_element_type=jnp.float32)
                  .reshape(S, B_pad, 4 * HIDDEN)
                  + b_f).astype(jnp.bfloat16)
    # Backward direction: only the last timestep feeds pooled[:, H:], and its
    # initial state is zero, so only x[S-1] @ W_ih_b (+ bias) is needed (f32,
    # tiny); W_hh_b never enters VMEM.
    gates_in_b_last = (jnp.dot(x[S - 1], wih_b,
                               preferred_element_type=jnp.float32)
                       + b_b)                                        # (B_pad, 512)

    wfc_f = params["wfc"][:HIDDEN].T                                 # (1, 128)
    wfc_b = params["wfc"][HIDDEN:].T                                 # (1, 128)

    # Batch tile: a leading "parallel" grid axis lets v7x's two TensorCores
    # split the batch when B_pad >= 16; single tile (no-op) otherwise.
    if B_pad >= 16 and (B_pad // 2) % 8 == 0:
        TB = B_pad // 2
    else:
        TB = B_pad

    # VMEM-budgeted sequence tile: keep the double-buffered bf16 gates slab
    # under ~24 MiB total so the kernel fits v7x's 64 MiB physical VMEM with
    # headroom (and trivially fits v5e/v6e's 128 MiB).
    GATES_DBUF_BUDGET = 24 * 1024 * 1024
    step_bytes = TB * 4 * HIDDEN * 2                                 # bf16
    TS = max(1, min(S, GATES_DBUF_BUDGET // (2 * step_bytes)))
    S_pad = ((S + TS - 1) // TS) * TS
    if S_pad != S:
        gates_in_f = jnp.pad(gates_in_f, ((0, S_pad - S), (0, 0), (0, 0)))

    grid = (B_pad // TB, S_pad // TS)
    kernel = functools.partial(lstm_kernel, seq_len=S)

    out = pl.pallas_call(
        kernel,
        out_shape=jax.ShapeDtypeStruct((B_pad, 1), jnp.float32),
        grid_spec=pltpu.PrefetchScalarGridSpec(
            num_scalar_prefetch=0,
            grid=grid,
            in_specs=[
                pl.BlockSpec((TS, TB, 4 * HIDDEN), lambda b, s: (s, b, 0)),
                pl.BlockSpec((HIDDEN, 4 * HIDDEN), lambda b, s: (0, 0)),
                pl.BlockSpec((TB, 4 * HIDDEN), lambda b, s: (b, 0)),
                pl.BlockSpec((1, HIDDEN), lambda b, s: (0, 0)),
                pl.BlockSpec((1, HIDDEN), lambda b, s: (0, 0)),
                pl.BlockSpec((1, 1), lambda b, s: (0, 0)),
            ],
            out_specs=pl.BlockSpec((TB, 1), lambda b, s: (b, 0)),
            scratch_shapes=[pltpu.VMEM((TB, HIDDEN), jnp.float32),
                            pltpu.VMEM((TB, HIDDEN), jnp.float32)],
        ),
        compiler_params=pltpu.CompilerParams(
            dimension_semantics=("parallel", "arbitrary"),   # batch || , seq carry
            vmem_limit_bytes=40 * 1024 * 1024),              # < v7x 64 MiB physical
    )(gates_in_f, whh_f, gates_in_b_last, wfc_f, wfc_b, params["bfc"])
    return out[:B]


if __name__ == "__main__":
    B, S = 2, 8
    key = jax.random.PRNGKey(0)
    k_ids, k_params = jax.random.split(key)

    params = init_params(k_params)
    input_ids = jax.random.randint(k_ids, (B, S), 0, VOCAB, dtype=jnp.int32)
    attention_mask = jnp.ones((B, S), jnp.int32).at[1, -2:].set(0)

    out = bert_lstm_forward(input_ids, attention_mask, params)
    out = jax.block_until_ready(out)
    assert out.shape == (B, 1)
    assert bool(jnp.all(jnp.isfinite(out)))
    assert bool(jnp.all((out >= 0.0) & (out <= 1.0)))
    print("KERNEL_OK")
</pallas_src>

<mosaic_0001>
module attributes {stable_mosaic.version = 11 : i64} {
  func.func @lstm_kernel(%arg0: i32, %arg1: i32, %arg2: memref<8x8x512xbf16, #tpu.memory_space<vmem>>, %arg3: memref<128x512xbf16, #tpu.memory_space<vmem>>, %arg4: memref<8x512xf32, #tpu.memory_space<vmem>>, %arg5: memref<1x128xf32, #tpu.memory_space<vmem>>, %arg6: memref<1x128xf32, #tpu.memory_space<vmem>>, %arg7: memref<1x1xf32, #tpu.memory_space<vmem>>, %arg8: memref<8x1xf32, #tpu.memory_space<vmem>>, %arg9: memref<8x128xf32, #tpu.memory_space<vmem>>, %arg10: memref<8x128xf32, #tpu.memory_space<vmem>>) attributes {dimension_semantics = [#tpu.dimension_semantics<parallel>, #tpu.dimension_semantics<arbitrary>], iteration_bounds = array<i64: 1, 1>, scalar_prefetch = 0 : i64, scratch_operands = 2 : i64, tpu.core_type = #tpu.core_type<tc>, window_params = [{transform_indices = @transform_0, window_bounds = array<i64: 8, 8, 512>}, {pipeline_mode = #tpu.pipeline_mode<synchronous>, transform_indices = @transform_1, window_bounds = array<i64: 128, 512>}, {transform_indices = @transform_2, window_bounds = array<i64: 8, 512>}, {pipeline_mode = #tpu.pipeline_mode<synchronous>, transform_indices = @transform_3, window_bounds = array<i64: 1, 128>}, {pipeline_mode = #tpu.pipeline_mode<synchronous>, transform_indices = @transform_4, window_bounds = array<i64: 1, 128>}, {pipeline_mode = #tpu.pipeline_mode<synchronous>, transform_indices = @transform_5, window_bounds = array<i64: 1, 1>}, {transform_indices = @transform_6, window_bounds = array<i64: 8, 1>}]} {
    %c0_i32 = arith.constant 0 : i32
    %0 = arith.cmpi eq, %arg1, %c0_i32 : i32
    %1 = arith.extui %0 : i1 to i32
    %c0_i32_0 = arith.constant 0 : i32
    %2 = arith.cmpi ne, %1, %c0_i32_0 : i32
    scf.if %2 {
      %cst_67 = arith.constant 0.000000e+00 : f32
      %235 = vector.broadcast %cst_67 : f32 to vector<8x128xf32>
      %c0_68 = arith.constant 0 : index
      %c0_69 = arith.constant 0 : index
      %236 = vector.load %arg9[%c0_68, %c0_69] : memref<8x128xf32, #tpu.memory_space<vmem>>, vector<8x128xf32>
      tpu.vector_store %arg9[%c0_68, %c0_69], %235 {strides = array<i32>} : memref<8x128xf32, #tpu.memory_space<vmem>>, vector<8x128xf32>,
      %cst_70 = arith.constant 0.000000e+00 : f32
      %237 = vector.broadcast %cst_70 : f32 to vector<8x128xf32>
      %c0_71 = arith.constant 0 : index
      %c0_72 = arith.constant 0 : index
      %238 = vector.load %arg10[%c0_71, %c0_72] : memref<8x128xf32, #tpu.memory_space<vmem>>, vector<8x128xf32>
      tpu.vector_store %arg10[%c0_71, %c0_72], %237 {strides = array<i32>} : memref<8x128xf32, #tpu.memory_space<vmem>>, vector<8x128xf32>,
    } else {
    }
    %c8_i32 = arith.constant 8 : i32
    %3 = arith.muli %arg1, %c8_i32 : i32
    %c0 = arith.constant 0 : index
    %c0_1 = arith.constant 0 : index
    %4 = vector.load %arg9[%c0, %c0_1] : memref<8x128xf32, #tpu.memory_space<vmem>>, vector<8x128xf32>
    %c0_2 = arith.constant 0 : index
    %c0_3 = arith.constant 0 : index
    %5 = vector.load %arg10[%c0_2, %c0_3] : memref<8x128xf32, #tpu.memory_space<vmem>>, vector<8x128xf32>
    %c0_i32_4 = arith.constant 0 : i32
    %6 = arith.truncf %4 : vector<8x128xf32> to vector<8x128xbf16>
    %c0_5 = arith.constant 0 : index
    %c0_6 = arith.constant 0 : index
    %7 = vector.load %arg3[%c0_5, %c0_6] : memref<128x512xbf16, #tpu.memory_space<vmem>>, vector<128x512xbf16>
    %cst = arith.constant dense<0.000000e+00> : vector<8x512xf32>
    %8 = tpu.matmul %6, %7, %cst {dimension_numbers = #tpu.dot_dimension_numbers<[1], [0], [0], [1], [0, 0, 1, 1], [], []>} : vector<8x128xbf16>, vector<128x512xbf16>, vector<8x512xf32> -> vector<8x512xf32>
    %9 = arith.index_cast %c0_i32_4 : i32 to index
    %c0_7 = arith.constant 0 : index
    %c0_8 = arith.constant 0 : index
    %10 = vector.load %arg2[%9, %c0_7, %c0_8] : memref<8x8x512xbf16, #tpu.memory_space<vmem>>, vector<1x8x512xbf16>
    %11 = vector.shape_cast %10 : vector<1x8x512xbf16> to vector<8x512xbf16>
    %12 = arith.extf %11 : vector<8x512xbf16> to vector<8x512xf32>
    %13 = arith.addf %12, %8 : vector<8x512xf32>
    %14 = vector.extract_strided_slice %13 {offsets = [0, 0], sizes = [8, 384], strides = [1, 1]} : vector<8x512xf32> to vector<8x384xf32>
    %15 = arith.negf %14 : vector<8x384xf32>
    %16 = math.exp %15 : vector<8x384xf32>
    %cst_9 = arith.constant 1.000000e+00 : f32
    %17 = vector.broadcast %cst_9 : f32 to vector<8x384xf32>
    %18 = arith.addf %17, %16 : vector<8x384xf32>
    %19 = arith.divf %17, %18 : vector<8x384xf32>
    %20 = vector.extract_strided_slice %19 {offsets = [0, 0], sizes = [8, 128], strides = [1, 1]} : vector<8x384xf32> to vector<8x128xf32>
    %21 = vector.extract_strided_slice %19 {offsets = [0, 128], sizes = [8, 128], strides = [1, 1]} : vector<8x384xf32> to vector<8x128xf32>
    %22 = vector.extract_strided_slice %19 {offsets = [0, 256], sizes = [8, 128], strides = [1, 1]} : vector<8x384xf32> to vector<8x128xf32>
    %23 = vector.extract_strided_slice %13 {offsets = [0, 384], sizes = [8, 128], strides = [1, 1]} : vector<8x512xf32> to vector<8x128xf32>
    %24 = math.tanh %23 : vector<8x128xf32>
    %25 = arith.mulf %21, %5 : vector<8x128xf32>
    %26 = arith.mulf %20, %24 : vector<8x128xf32>
    %27 = arith.addf %25, %26 : vector<8x128xf32>
    %28 = math.tanh %27 : vector<8x128xf32>
    %29 = arith.mulf %22, %28 : vector<8x128xf32>
    %30 = arith.addi %3, %c0_i32_4 : i32
    %c8_i32_10 = arith.constant 8 : i32
    %31 = arith.cmpi slt, %30, %c8_i32_10 : i32
    %32 = arith.select %31, %29, %4 : vector<8x128xf32>
    %33 = arith.select %31, %27, %5 : vector<8x128xf32>
    %c1_i32 = arith.constant 1 : i32
    %34 = arith.truncf %32 : vector<8x128xf32> to vector<8x128xbf16>
    %c0_11 = arith.constant 0 : index
    %c0_12 = arith.constant 0 : index
    %35 = vector.load %arg3[%c0_11, %c0_12] : memref<128x512xbf16, #tpu.memory_space<vmem>>, vector<128x512xbf16>
    %cst_13 = arith.constant dense<0.000000e+00> : vector<8x512xf32>
    %36 = tpu.matmul %34, %35, %cst_13 {dimension_numbers = #tpu.dot_dimension_numbers<[1], [0], [0], [1], [0, 0, 1, 1], [], []>} : vector<8x128xbf16>, vector<128x512xbf16>, vector<8x512xf32> -> vector<8x512xf32>
    %37 = arith.index_cast %c1_i32 : i32 to index
    %c0_14 = arith.constant 0 : index
    %c0_15 = arith.constant 0 : index
    %38 = vector.load %arg2[%37, %c0_14, %c0_15] : memref<8x8x512xbf16, #tpu.memory_space<vmem>>, vector<1x8x512xbf16>
    %39 = vector.shape_cast %38 : vector<1x8x512xbf16> to vector<8x512xbf16>
    %40 = arith.extf %39 : vector<8x512xbf16> to vector<8x512xf32>
    %41 = arith.addf %40, %36 : vector<8x512xf32>
    %42 = vector.extract_strided_slice %41 {offsets = [0, 0], sizes = [8, 384], strides = [1, 1]} : vector<8x512xf32> to vector<8x384xf32>
    %43 = arith.negf %42 : vector<8x384xf32>
    %44 = math.exp %43 : vector<8x384xf32>
    %cst_16 = arith.constant 1.000000e+00 : f32
    %45 = vector.broadcast %cst_16 : f32 to vector<8x384xf32>
    %46 = arith.addf %45, %44 : vector<8x384xf32>
    %47 = arith.divf %45, %46 : vector<8x384xf32>
    %48 = vector.extract_strided_slice %47 {offsets = [0, 0], sizes = [8, 128], strides = [1, 1]} : vector<8x384xf32> to vector<8x128xf32>
    %49 = vector.extract_strided_slice %47 {offsets = [0, 128], sizes = [8, 128], strides = [1, 1]} : vector<8x384xf32> to vector<8x128xf32>
    %50 = vector.extract_strided_slice %47 {offsets = [0, 256], sizes = [8, 128], strides = [1, 1]} : vector<8x384xf32> to vector<8x128xf32>
    %51 = vector.extract_strided_slice %41 {offsets = [0, 384], sizes = [8, 128], strides = [1, 1]} : vector<8x512xf32> to vector<8x128xf32>
    %52 = math.tanh %51 : vector<8x128xf32>
    %53 = arith.mulf %49, %33 : vector<8x128xf32>
    %54 = arith.mulf %48, %52 : vector<8x128xf32>
    %55 = arith.addf %53, %54 : vector<8x128xf32>
    %56 = math.tanh %55 : vector<8x128xf32>
    %57 = arith.mulf %50, %56 : vector<8x128xf32>
    %58 = arith.addi %3, %c1_i32 : i32
    %c8_i32_17 = arith.constant 8 : i32
    %59 = arith.cmpi slt, %58, %c8_i32_17 : i32
    %60 = arith.select %59, %57, %32 : vector<8x128xf32>
    %61 = arith.select %59, %55, %33 : vector<8x128xf32>
    %c2_i32 = arith.constant 2 : i32
    %62 = arith.truncf %60 : vector<8x128xf32> to vector<8x128xbf16>
    %c0_18 = arith.constant 0 : index
    %c0_19 = arith.constant 0 : index
    %63 = vector.load %arg3[%c0_18, %c0_19] : memref<128x512xbf16, #tpu.memory_space<vmem>>, vector<128x512xbf16>
    %cst_20 = arith.constant dense<0.000000e+00> : vector<8x512xf32>
    %64 = tpu.matmul %62, %63, %cst_20 {dimension_numbers = #tpu.dot_dimension_numbers<[1], [0], [0], [1], [0, 0, 1, 1], [], []>} : vector<8x128xbf16>, vector<128x512xbf16>, vector<8x512xf32> -> vector<8x512xf32>
    %65 = arith.index_cast %c2_i32 : i32 to index
    %c0_21 = arith.constant 0 : index
    %c0_22 = arith.constant 0 : index
    %66 = vector.load %arg2[%65, %c0_21, %c0_22] : memref<8x8x512xbf16, #tpu.memory_space<vmem>>, vector<1x8x512xbf16>
    %67 = vector.shape_cast %66 : vector<1x8x512xbf16> to vector<8x512xbf16>
    %68 = arith.extf %67 : vector<8x512xbf16> to vector<8x512xf32>
    %69 = arith.addf %68, %64 : vector<8x512xf32>
    %70 = vector.extract_strided_slice %69 {offsets = [0, 0], sizes = [8, 384], strides = [1, 1]} : vector<8x512xf32> to vector<8x384xf32>
    %71 = arith.negf %70 : vector<8x384xf32>
    %72 = math.exp %71 : vector<8x384xf32>
    %cst_23 = arith.constant 1.000000e+00 : f32
    %73 = vector.broadcast %cst_23 : f32 to vector<8x384xf32>
    %74 = arith.addf %73, %72 : vector<8x384xf32>
    %75 = arith.divf %73, %74 : vector<8x384xf32>
    %76 = vector.extract_strided_slice %75 {offsets = [0, 0], sizes = [8, 128], strides = [1, 1]} : vector<8x384xf32> to vector<8x128xf32>
    %77 = vector.extract_strided_slice %75 {offsets = [0, 128], sizes = [8, 128], strides = [1, 1]} : vector<8x384xf32> to vector<8x128xf32>
    %78 = vector.extract_strided_slice %75 {offsets = [0, 256], sizes = [8, 128], strides = [1, 1]} : vector<8x384xf32> to vector<8x128xf32>
    %79 = vector.extract_strided_slice %69 {offsets = [0, 384], sizes = [8, 128], strides = [1, 1]} : vector<8x512xf32> to vector<8x128xf32>
    %80 = math.tanh %79 : vector<8x128xf32>
    %81 = arith.mulf %77, %61 : vector<8x128xf32>
    %82 = arith.mulf %76, %80 : vector<8x128xf32>
    %83 = arith.addf %81, %82 : vector<8x128xf32>
    %84 = math.tanh %83 : vector<8x128xf32>
    %85 = arith.mulf %78, %84 : vector<8x128xf32>
    %86 = arith.addi %3, %c2_i32 : i32
    %c8_i32_24 = arith.constant 8 : i32
    %87 = arith.cmpi slt, %86, %c8_i32_24 : i32
    %88 = arith.select %87, %85, %60 : vector<8x128xf32>
    %89 = arith.select %87, %83, %61 : vector<8x128xf32>
    %c3_i32 = arith.constant 3 : i32
    %90 = arith.truncf %88 : vector<8x128xf32> to vector<8x128xbf16>
    %c0_25 = arith.constant 0 : index
    %c0_26 = arith.constant 0 : index
    %91 = vector.load %arg3[%c0_25, %c0_26] : memref<128x512xbf16, #tpu.memory_space<vmem>>, vector<128x512xbf16>
    %cst_27 = arith.constant dense<0.000000e+00> : vector<8x512xf32>
    %92 = tpu.matmul %90, %91, %cst_27 {dimension_numbers = #tpu.dot_dimension_numbers<[1], [0], [0], [1], [0, 0, 1, 1], [], []>} : vector<8x128xbf16>, vector<128x512xbf16>, vector<8x512xf32> -> vector<8x512xf32>
    %93 = arith.index_cast %c3_i32 : i32 to index
    %c0_28 = arith.constant 0 : index
    %c0_29 = arith.constant 0 : index
    %94 = vector.load %arg2[%93, %c0_28, %c0_29] : memref<8x8x512xbf16, #tpu.memory_space<vmem>>, vector<1x8x512xbf16>
    %95 = vector.shape_cast %94 : vector<1x8x512xbf16> to vector<8x512xbf16>
    %96 = arith.extf %95 : vector<8x512xbf16> to vector<8x512xf32>
    %97 = arith.addf %96, %92 : vector<8x512xf32>
    %98 = vector.extract_strided_slice %97 {offsets = [0, 0], sizes = [8, 384], strides = [1, 1]} : vector<8x512xf32> to vector<8x384xf32>
    %99 = arith.negf %98 : vector<8x384xf32>
    %100 = math.exp %99 : vector<8x384xf32>
    %cst_30 = arith.constant 1.000000e+00 : f32
    %101 = vector.broadcast %cst_30 : f32 to vector<8x384xf32>
    %102 = arith.addf %101, %100 : vector<8x384xf32>
    %103 = arith.divf %101, %102 : vector<8x384xf32>
    %104 = vector.extract_strided_slice %103 {offsets = [0, 0], sizes = [8, 128], strides = [1, 1]} : vector<8x384xf32> to vector<8x128xf32>
    %105 = vector.extract_strided_slice %103 {offsets = [0, 128], sizes = [8, 128], strides = [1, 1]} : vector<8x384xf32> to vector<8x128xf32>
    %106 = vector.extract_strided_slice %103 {offsets = [0, 256], sizes = [8, 128], strides = [1, 1]} : vector<8x384xf32> to vector<8x128xf32>
    %107 = vector.extract_strided_slice %97 {offsets = [0, 384], sizes = [8, 128], strides = [1, 1]} : vector<8x512xf32> to vector<8x128xf32>
    %108 = math.tanh %107 : vector<8x128xf32>
    %109 = arith.mulf %105, %89 : vector<8x128xf32>
    %110 = arith.mulf %104, %108 : vector<8x128xf32>
    %111 = arith.addf %109, %110 : vector<8x128xf32>
    %112 = math.tanh %111 : vector<8x128xf32>
    %113 = arith.mulf %106, %112 : vector<8x128xf32>
    %114 = arith.addi %3, %c3_i32 : i32
    %c8_i32_31 = arith.constant 8 : i32
    %115 = arith.cmpi slt, %114, %c8_i32_31 : i32
    %116 = arith.select %115, %113, %88 : vector<8x128xf32>
    %117 = arith.select %115, %111, %89 : vector<8x128xf32>
    %c4_i32 = arith.constant 4 : i32
    %118 = arith.truncf %116 : vector<8x128xf32> to vector<8x128xbf16>
    %c0_32 = arith.constant 0 : index
    %c0_33 = arith.constant 0 : index
    %119 = vector.load %arg3[%c0_32, %c0_33] : memref<128x512xbf16, #tpu.memory_space<vmem>>, vector<128x512xbf16>
    %cst_34 = arith.constant dense<0.000000e+00> : vector<8x512xf32>
    %120 = tpu.matmul %118, %119, %cst_34 {dimension_numbers = #tpu.dot_dimension_numbers<[1], [0], [0], [1], [0, 0, 1, 1], [], []>} : vector<8x128xbf16>, vector<128x512xbf16>, vector<8x512xf32> -> vector<8x512xf32>
    %121 = arith.index_cast %c4_i32 : i32 to index
    %c0_35 = arith.constant 0 : index
    %c0_36 = arith.constant 0 : index
    %122 = vector.load %arg2[%121, %c0_35, %c0_36] : memref<8x8x512xbf16, #tpu.memory_space<vmem>>, vector<1x8x512xbf16>
    %123 = vector.shape_cast %122 : vector<1x8x512xbf16> to vector<8x512xbf16>
    %124 = arith.extf %123 : vector<8x512xbf16> to vector<8x512xf32>
    %125 = arith.addf %124, %120 : vector<8x512xf32>
    %126 = vector.extract_strided_slice %125 {offsets = [0, 0], sizes = [8, 384], strides = [1, 1]} : vector<8x512xf32> to vector<8x384xf32>
    %127 = arith.negf %126 : vector<8x384xf32>
    %128 = math.exp %127 : vector<8x384xf32>
    %cst_37 = arith.constant 1.000000e+00 : f32
    %129 = vector.broadcast %cst_37 : f32 to vector<8x384xf32>
    %130 = arith.addf %129, %128 : vector<8x384xf32>
    %131 = arith.divf %129, %130 : vector<8x384xf32>
    %132 = vector.extract_strided_slice %131 {offsets = [0, 0], sizes = [8, 128], strides = [1, 1]} : vector<8x384xf32> to vector<8x128xf32>
    %133 = vector.extract_strided_slice %131 {offsets = [0, 128], sizes = [8, 128], strides = [1, 1]} : vector<8x384xf32> to vector<8x128xf32>
    %134 = vector.extract_strided_slice %131 {offsets = [0, 256], sizes = [8, 128], strides = [1, 1]} : vector<8x384xf32> to vector<8x128xf32>
    %135 = vector.extract_strided_slice %125 {offsets = [0, 384], sizes = [8, 128], strides = [1, 1]} : vector<8x512xf32> to vector<8x128xf32>
    %136 = math.tanh %135 : vector<8x128xf32>
    %137 = arith.mulf %133, %117 : vector<8x128xf32>
    %138 = arith.mulf %132, %136 : vector<8x128xf32>
    %139 = arith.addf %137, %138 : vector<8x128xf32>
    %140 = math.tanh %139 : vector<8x128xf32>
    %141 = arith.mulf %134, %140 : vector<8x128xf32>
    %142 = arith.addi %3, %c4_i32 : i32
    %c8_i32_38 = arith.constant 8 : i32
    %143 = arith.cmpi slt, %142, %c8_i32_38 : i32
    %144 = arith.select %143, %141, %116 : vector<8x128xf32>
    %145 = arith.select %143, %139, %117 : vector<8x128xf32>
    %c5_i32 = arith.constant 5 : i32
    %146 = arith.truncf %144 : vector<8x128xf32> to vector<8x128xbf16>
    %c0_39 = arith.constant 0 : index
    %c0_40 = arith.constant 0 : index
    %147 = vector.load %arg3[%c0_39, %c0_40] : memref<128x512xbf16, #tpu.memory_space<vmem>>, vector<128x512xbf16>
    %cst_41 = arith.constant dense<0.000000e+00> : vector<8x512xf32>
    %148 = tpu.matmul %146, %147, %cst_41 {dimension_numbers = #tpu.dot_dimension_numbers<[1], [0], [0], [1], [0, 0, 1, 1], [], []>} : vector<8x128xbf16>, vector<128x512xbf16>, vector<8x512xf32> -> vector<8x512xf32>
    %149 = arith.index_cast %c5_i32 : i32 to index
    %c0_42 = arith.constant 0 : index
    %c0_43 = arith.constant 0 : index
    %150 = vector.load %arg2[%149, %c0_42, %c0_43] : memref<8x8x512xbf16, #tpu.memory_space<vmem>>, vector<1x8x512xbf16>
    %151 = vector.shape_cast %150 : vector<1x8x512xbf16> to vector<8x512xbf16>
    %152 = arith.extf %151 : vector<8x512xbf16> to vector<8x512xf32>
    %153 = arith.addf %152, %148 : vector<8x512xf32>
    %154 = vector.extract_strided_slice %153 {offsets = [0, 0], sizes = [8, 384], strides = [1, 1]} : vector<8x512xf32> to vector<8x384xf32>
    %155 = arith.negf %154 : vector<8x384xf32>
    %156 = math.exp %155 : vector<8x384xf32>
    %cst_44 = arith.constant 1.000000e+00 : f32
    %157 = vector.broadcast %cst_44 : f32 to vector<8x384xf32>
    %158 = arith.addf %157, %156 : vector<8x384xf32>
    %159 = arith.divf %157, %158 : vector<8x384xf32>
    %160 = vector.extract_strided_slice %159 {offsets = [0, 0], sizes = [8, 128], strides = [1, 1]} : vector<8x384xf32> to vector<8x128xf32>
    %161 = vector.extract_strided_slice %159 {offsets = [0, 128], sizes = [8, 128], strides = [1, 1]} : vector<8x384xf32> to vector<8x128xf32>
    %162 = vector.extract_strided_slice %159 {offsets = [0, 256], sizes = [8, 128], strides = [1, 1]} : vector<8x384xf32> to vector<8x128xf32>
    %163 = vector.extract_strided_slice %153 {offsets = [0, 384], sizes = [8, 128], strides = [1, 1]} : vector<8x512xf32> to vector<8x128xf32>
    %164 = math.tanh %163 : vector<8x128xf32>
    %165 = arith.mulf %161, %145 : vector<8x128xf32>
    %166 = arith.mulf %160, %164 : vector<8x128xf32>
    %167 = arith.addf %165, %166 : vector<8x128xf32>
    %168 = math.tanh %167 : vector<8x128xf32>
    %169 = arith.mulf %162, %168 : vector<8x128xf32>
    %170 = arith.addi %3, %c5_i32 : i32
    %c8_i32_45 = arith.constant 8 : i32
    %171 = arith.cmpi slt, %170, %c8_i32_45 : i32
    %172 = arith.select %171, %169, %144 : vector<8x128xf32>
    %173 = arith.select %171, %167, %145 : vector<8x128xf32>
    %c6_i32 = arith.constant 6 : i32
    %174 = arith.truncf %172 : vector<8x128xf32> to vector<8x128xbf16>
    %c0_46 = arith.constant 0 : index
    %c0_47 = arith.constant 0 : index
    %175 = vector.load %arg3[%c0_46, %c0_47] : memref<128x512xbf16, #tpu.memory_space<vmem>>, vector<128x512xbf16>
    %cst_48 = arith.constant dense<0.000000e+00> : vector<8x512xf32>
    %176 = tpu.matmul %174, %175, %cst_48 {dimension_numbers = #tpu.dot_dimension_numbers<[1], [0], [0], [1], [0, 0, 1, 1], [], []>} : vector<8x128xbf16>, vector<128x512xbf16>, vector<8x512xf32> -> vector<8x512xf32>
    %177 = arith.index_cast %c6_i32 : i32 to index
    %c0_49 = arith.constant 0 : index
    %c0_50 = arith.constant 0 : index
    %178 = vector.load %arg2[%177, %c0_49, %c0_50] : memref<8x8x512xbf16, #tpu.memory_space<vmem>>, vector<1x8x512xbf16>
    %179 = vector.shape_cast %178 : vector<1x8x512xbf16> to vector<8x512xbf16>
    %180 = arith.extf %179 : vector<8x512xbf16> to vector<8x512xf32>
    %181 = arith.addf %180, %176 : vector<8x512xf32>
    %182 = vector.extract_strided_slice %181 {offsets = [0, 0], sizes = [8, 384], strides = [1, 1]} : vector<8x512xf32> to vector<8x384xf32>
    %183 = arith.negf %182 : vector<8x384xf32>
    %184 = math.exp %183 : vector<8x384xf32>
    %cst_51 = arith.constant 1.000000e+00 : f32
    %185 = vector.broadcast %cst_51 : f32 to vector<8x384xf32>
    %186 = arith.addf %185, %184 : vector<8x384xf32>
    %187 = arith.divf %185, %186 : vector<8x384xf32>
    %188 = vector.extract_strided_slice %187 {offsets = [0, 0], sizes = [8, 128], strides = [1, 1]} : vector<8x384xf32> to vector<8x128xf32>
    %189 = vector.extract_strided_slice %187 {offsets = [0, 128], sizes = [8, 128], strides = [1, 1]} : vector<8x384xf32> to vector<8x128xf32>
    %190 = vector.extract_strided_slice %187 {offsets = [0, 256], sizes = [8, 128], strides = [1, 1]} : vector<8x384xf32> to vector<8x128xf32>
    %191 = vector.extract_strided_slice %181 {offsets = [0, 384], sizes = [8, 128], strides = [1, 1]} : vector<8x512xf32> to vector<8x128xf32>
    %192 = math.tanh %191 : vector<8x128xf32>
    %193 = arith.mulf %189, %173 : vector<8x128xf32>
    %194 = arith.mulf %188, %192 : vector<8x128xf32>
    %195 = arith.addf %193, %194 : vector<8x128xf32>
    %196 = math.tanh %195 : vector<8x128xf32>
    %197 = arith.mulf %190, %196 : vector<8x128xf32>
    %198 = arith.addi %3, %c6_i32 : i32
    %c8_i32_52 = arith.constant 8 : i32
    %199 = arith.cmpi slt, %198, %c8_i32_52 : i32
    %200 = arith.select %199, %197, %172 : vector<8x128xf32>
    %201 = arith.select %199, %195, %173 : vector<8x128xf32>
    %c7_i32 = arith.constant 7 : i32
    %202 = arith.truncf %200 : vector<8x128xf32> to vector<8x128xbf16>
    %c0_53 = arith.constant 0 : index
    %c0_54 = arith.constant 0 : index
    %203 = vector.load %arg3[%c0_53, %c0_54] : memref<128x512xbf16, #tpu.memory_space<vmem>>, vector<128x512xbf16>
    %cst_55 = arith.constant dense<0.000000e+00> : vector<8x512xf32>
    %204 = tpu.matmul %202, %203, %cst_55 {dimension_numbers = #tpu.dot_dimension_numbers<[1], [0], [0], [1], [0, 0, 1, 1], [], []>} : vector<8x128xbf16>, vector<128x512xbf16>, vector<8x512xf32> -> vector<8x512xf32>
    %205 = arith.index_cast %c7_i32 : i32 to index
    %c0_56 = arith.constant 0 : index
    %c0_57 = arith.constant 0 : index
    %206 = vector.load %arg2[%205, %c0_56, %c0_57] : memref<8x8x512xbf16, #tpu.memory_space<vmem>>, vector<1x8x512xbf16>
    %207 = vector.shape_cast %206 : vector<1x8x512xbf16> to vector<8x512xbf16>
    %208 = arith.extf %207 : vector<8x512xbf16> to vector<8x512xf32>
    %209 = arith.addf %208, %204 : vector<8x512xf32>
    %210 = vector.extract_strided_slice %209 {offsets = [0, 0], sizes = [8, 384], strides = [1, 1]} : vector<8x512xf32> to vector<8x384xf32>
    %211 = arith.negf %210 : vector<8x384xf32>
    %212 = math.exp %211 : vector<8x384xf32>
    %cst_58 = arith.constant 1.000000e+00 : f32
    %213 = vector.broadcast %cst_58 : f32 to vector<8x384xf32>
    %214 = arith.addf %213, %212 : vector<8x384xf32>
    %215 = arith.divf %213, %214 : vector<8x384xf32>
    %216 = vector.extract_strided_slice %215 {offsets = [0, 0], sizes = [8, 128], strides = [1, 1]} : vector<8x384xf32> to vector<8x128xf32>
    %217 = vector.extract_strided_slice %215 {offsets = [0, 128], sizes = [8, 128], strides = [1, 1]} : vector<8x384xf32> to vector<8x128xf32>
    %218 = vector.extract_strided_slice %215 {offsets = [0, 256], sizes = [8, 128], strides = [1, 1]} : vector<8x384xf32> to vector<8x128xf32>
    %219 = vector.extract_strided_slice %209 {offsets = [0, 384], sizes = [8, 128], strides = [1, 1]} : vector<8x512xf32> to vector<8x128xf32>
    %220 = math.tanh %219 : vector<8x128xf32>
    %221 = arith.mulf %217, %201 : vector<8x128xf32>
    %222 = arith.mulf %216, %220 : vector<8x128xf32>
    %223 = arith.addf %221, %222 : vector<8x128xf32>
    %224 = math.tanh %223 : vector<8x128xf32>
    %225 = arith.mulf %218, %224 : vector<8x128xf32>
    %226 = arith.addi %3, %c7_i32 : i32
    %c8_i32_59 = arith.constant 8 : i32
    %227 = arith.cmpi slt, %226, %c8_i32_59 : i32
    %228 = arith.select %227, %225, %200 : vector<8x128xf32>
    %229 = arith.select %227, %223, %201 : vector<8x128xf32>
    %c8_i32_60 = arith.constant 8 : i32
    %c0_61 = arith.constant 0 : index
    %c0_62 = arith.constant 0 : index
    %230 = vector.load %arg9[%c0_61, %c0_62] : memref<8x128xf32, #tpu.memory_space<vmem>>, vector<8x128xf32>
    tpu.vector_store %arg9[%c0_61, %c0_62], %228 {strides = array<i32>} : memref<8x128xf32, #tpu.memory_space<vmem>>, vector<8x128xf32>,
    %c0_63 = arith.constant 0 : index
    %c0_64 = arith.constant 0 : index
    %231 = vector.load %arg10[%c0_63, %c0_64] : memref<8x128xf32, #tpu.memory_space<vmem>>, vector<8x128xf32>
    tpu.vector_store %arg10[%c0_63, %c0_64], %229 {strides = array<i32>} : memref<8x128xf32, #tpu.memory_space<vmem>>, vector<8x128xf32>,
    %c0_i32_65 = arith.constant 0 : i32
    %232 = arith.cmpi eq, %arg1, %c0_i32_65 : i32
    %233 = arith.extui %232 : i1 to i32
    %c0_i32_66 = arith.constant 0 : i32
    %234 = arith.cmpi ne, %233, %c0_i32_66 : i32
    scf.if %234 {
      %c0_67 = arith.constant 0 : index
      %c0_68 = arith.constant 0 : index
      %235 = vector.load %arg4[%c0_67, %c0_68] : memref<8x512xf32, #tpu.memory_space<vmem>>, vector<8x512xf32>
      %236 = vector.extract_strided_slice %235 {offsets = [0, 0], sizes = [8, 384], strides = [1, 1]} : vector<8x512xf32> to vector<8x384xf32>
      %237 = arith.negf %236 : vector<8x384xf32>
      %238 = math.exp %237 : vector<8x384xf32>
      %cst_69 = arith.constant 1.000000e+00 : f32
      %239 = vector.broadcast %cst_69 : f32 to vector<8x384xf32>
      %240 = arith.addf %239, %238 : vector<8x384xf32>
      %241 = arith.divf %239, %240 : vector<8x384xf32>
      %242 = vector.extract_strided_slice %241 {offsets = [0, 0], sizes = [8, 128], strides = [1, 1]} : vector<8x384xf32> to vector<8x128xf32>
      %243 = vector.extract_strided_slice %241 {offsets = [0, 256], sizes = [8, 128], strides = [1, 1]} : vector<8x384xf32> to vector<8x128xf32>
      %244 = vector.extract_strided_slice %235 {offsets = [0, 384], sizes = [8, 128], strides = [1, 1]} : vector<8x512xf32> to vector<8x128xf32>
      %245 = math.tanh %244 : vector<8x128xf32>
      %246 = arith.mulf %242, %245 : vector<8x128xf32>
      %247 = math.tanh %246 : vector<8x128xf32>
      %248 = arith.mulf %243, %247 : vector<8x128xf32>
      %c0_70 = arith.constant 0 : index
      %c0_71 = arith.constant 0 : index
      %249 = vector.load %arg5[%c0_70, %c0_71] : memref<1x128xf32, #tpu.memory_space<vmem>>, vector<1x128xf32>
      %250 = vector.broadcast %249 : vector<1x128xf32> to vector<8x128xf32>
      %251 = arith.mulf %228, %250 : vector<8x128xf32>
      %cst_72 = arith.constant dense<0.000000e+00> : vector<8xf32>
      %252 = vector.multi_reduction <add>, %251, %cst_72 [1] : vector<8x128xf32> to vector<8xf32>
      %253 = vector.shape_cast %252 : vector<8xf32> to vector<8x1xf32>
      %c0_73 = arith.constant 0 : index
      %c0_74 = arith.constant 0 : index
      %254 = vector.load %arg6[%c0_73, %c0_74] : memref<1x128xf32, #tpu.memory_space<vmem>>, vector<1x128xf32>
      %255 = vector.broadcast %254 : vector<1x128xf32> to vector<8x128xf32>
      %256 = arith.mulf %248, %255 : vector<8x128xf32>
      %cst_75 = arith.constant dense<0.000000e+00> : vector<8xf32>
      %257 = vector.multi_reduction <add>, %256, %cst_75 [1] : vector<8x128xf32> to vector<8xf32>
      %258 = vector.shape_cast %257 : vector<8xf32> to vector<8x1xf32>
      %259 = arith.addf %253, %258 : vector<8x1xf32>
      %c0_76 = arith.constant 0 : index
      %c0_77 = arith.constant 0 : index
      %260 = vector.load %arg7[%c0_76, %c0_77] : memref<1x1xf32, #tpu.memory_space<vmem>>, vector<1x1xf32>
      %261 = vector.broadcast %260 : vector<1x1xf32> to vector<8x1xf32>
      %262 = arith.addf %259, %261 : vector<8x1xf32>
      %263 = arith.negf %262 : vector<8x1xf32>
      %264 = math.exp %263 : vector<8x1xf32>
      %cst_78 = arith.constant 1.000000e+00 : f32
      %265 = vector.broadcast %cst_78 : f32 to vector<8x1xf32>
      %266 = arith.addf %265, %264 : vector<8x1xf32>
      %267 = arith.divf %265, %266 : vector<8x1xf32>
      %c0_79 = arith.constant 0 : index
      %c0_80 = arith.constant 0 : index
      %268 = vector.load %arg8[%c0_79, %c0_80] : memref<8x1xf32, #tpu.memory_space<vmem>>, vector<8x1xf32>
      tpu.vector_store %arg8[%c0_79, %c0_80], %267 {strides = array<i32>} : memref<8x1xf32, #tpu.memory_space<vmem>>, vector<8x1xf32>,
    } else {
    }
    return
  }
  func.func @transform_0(%arg0: i32, %arg1: i32) -> (i32, i32, i32) {
    %c0_i32 = arith.constant 0 : i32
    %c0_i32_0 = arith.constant 0 : i32
    return %arg1, %arg0, %c0_i32 : i32, i32, i32
  }
  func.func @transform_1(%arg0: i32, %arg1: i32) -> (i32, i32) {
    %c0_i32 = arith.constant 0 : i32
    %c0_i32_0 = arith.constant 0 : i32
    %c0_i32_1 = arith.constant 0 : i32
    return %c0_i32, %c0_i32_0 : i32, i32
  }
  func.func @transform_2(%arg0: i32, %arg1: i32) -> (i32, i32) {
    %c0_i32 = arith.constant 0 : i32
    %c0_i32_0 = arith.constant 0 : i32
    return %arg0, %c0_i32 : i32, i32
  }
  func.func @transform_3(%arg0: i32, %arg1: i32) -> (i32, i32) {
    %c0_i32 = arith.constant 0 : i32
    %c0_i32_0 = arith.constant 0 : i32
    %c0_i32_1 = arith.constant 0 : i32
    return %c0_i32, %c0_i32_0 : i32, i32
  }
  func.func @transform_4(%arg0: i32, %arg1: i32) -> (i32, i32) {
    %c0_i32 = arith.constant 0 : i32
    %c0_i32_0 = arith.constant 0 : i32
    %c0_i32_1 = arith.constant 0 : i32
    return %c0_i32, %c0_i32_0 : i32, i32
  }
  func.func @transform_5(%arg0: i32, %arg1: i32) -> (i32, i32) {
    %c0_i32 = arith.constant 0 : i32
    %c0_i32_0 = arith.constant 0 : i32
    %c0_i32_1 = arith.constant 0 : i32
    return %c0_i32, %c0_i32_0 : i32, i32
  }
  func.func @transform_6(%arg0: i32, %arg1: i32) -> (i32, i32) {
    %c0_i32 = arith.constant 0 : i32
    %c0_i32_0 = arith.constant 0 : i32
    return %arg0, %c0_i32 : i32, i32
  }
}

</mosaic_0001>

<bundles_post_ra>
// kernel: tpu_custom_call.1
= control target key start
LH: loop header
LB: loop body
LE: loop exit
PB: predicated region body
PF: predicated region fallthrough
CT: control target
= control target key end

     0   :  { %s2119_s0 = inlined_call_operand.hbm [shape: bf16[8,8,512], index: 0, kind: input, shape index: {}]   ;;  %s2120_s1 = inlined_call_operand.hbm [shape: bf16[128,512], index: 1, kind: input, shape index: {}]   ;;  %s2121_s2 = inlined_call_operand.hbm [shape: f32[8,512], index: 2, kind: input, shape index: {}]   ;;  %s2122_s3 = inlined_call_operand.vmem [shape: f32[1,128], index: 3, kind: input, shape index: {}]   ;;  %s2123_s4 = inlined_call_operand.vmem [shape: f32[1,128], index: 4, kind: input, shape index: {}]   ;;  %s2124_s5 = inlined_call_operand.<no memory space> [shape: f32[1,1], index: 5, kind: input, shape index: {}]   ;;  %s2125_s6 = inlined_call_operand.vmem [shape: f32[8,1], index: 6, kind: output, shape index: {}]  }
   0x1   :  { %v11_v0 = vstv %s2124_s5 }
   0x2   :  { %12 = vst [vmem:[#allocation4] sm:$0x1] %v11_v0 }
   0x3   :  { %13 = vsyncpa [#allocation6], 0 }
   0x4   :  { %14 = vsyncpa [#allocation8], 0  ;;  %s1694_s23 = smov [#allocation7]   ;;  %s1695_s25 = smov [#allocation5]  }
   0x5   :  { %s32_s24 = sshll.u32 %s1694_s23, 4  ;;  %s20_s26 = sshll.u32 %s1695_s25, 4  ;;  %s33_s24 = int_to_ptr.vmem [resolvable:$true] %s32_s24  ;;  %s1739_s26 = int_to_ptr.vmem [resolvable:$true] %s20_s26 }
   0x6   :  { %s1624_s29 = scalar_lea.hbm %s2120_s1, 4096 }
   0x7   :  { %p1625_p0 = scmp.ne.s32.totalorder %s2120_s1, %s1624_s29  ;;  %p1628_p1 = scmp.lt.u32.totalorder %s1624_s29, %s2120_s1 }
   0x9   :  { %p1630_p2 = pnand %p1628_p1, %p1625_p0 }
   0xb   :  { %1633 = shalt.err (!%p1630_p2)
}
   0xc   :  { %s1634_s9 = scalar_lea.vmem %s33_s24, 4096  ;;  %p1639_p4 = scmp.lt.s32.totalorder %s33_s24, %s33_s24 }
   0xd   :  { %p1635_p3 = scmp.ne.s32.totalorder %s33_s24, %s1634_s9  ;;  %p1640_p5 = scmp.lt.s32.totalorder %s1634_s9, %s1634_s9 }
   0xf   :  { %p1641_p6 = por %p1640_p5, %p1639_p4 }
  0x11   :  { %p1642_p7 = pnand %p1641_p6, %p1635_p3 }
  0x13   :  { %1645 = shalt.err (!%p1642_p7)
}
  0x14   :  { %s1696_s10 = smov 256   ;;  %s1697_s11 = smov 16  }
  0x15   :  { %38 = dma.hbm_to_vmem [thread:$0]  %s2120_s1, 4096, %s33_s24, [#allocation8], %s1696_s10, %s1696_s10, %s1697_s11  }
  0x16   :  { %s1646_s16 = scalar_lea.hbm %s2119_s0, 2048 }
  0x17   :  { %p1647_p8 = scmp.ne.s32.totalorder %s2119_s0, %s1646_s16  ;;  %p1650_p9 = scmp.lt.u32.totalorder %s1646_s16, %s2119_s0 }
  0x19   :  { %p1652_p10 = pnand %p1650_p9, %p1647_p8 }
  0x1b   :  { %1655 = shalt.err (!%p1652_p10)
}
  0x1c   :  { %s1656_s21 = scalar_lea.vmem %s1739_s26, 2048  ;;  %p1661_p12 = scmp.lt.s32.totalorder %s1739_s26, %s1739_s26 }
  0x1d   :  { %p1657_p11 = scmp.ne.s32.totalorder %s1739_s26, %s1656_s21  ;;  %p1662_p13 = scmp.lt.s32.totalorder %s1656_s21, %s1656_s21 }
  0x1f   :  { %p1663_p0 = por %p1662_p13, %p1661_p12 }
  0x21   :  { %p1664_p1 = pnand %p1663_p0, %p1657_p11 }
  0x23   :  { %1667 = shalt.err (!%p1664_p1)
}
  0x24   :  { %26 = dma.hbm_to_vmem [thread:$0]  %s2119_s0, 2048, %s1739_s26, [#allocation6], %s1696_s10, %s1696_s10, %s1697_s11  }
  0x25   :  { %s1698_s23 = smov [#allocation9]   ;;  %s1668_s28 = scalar_lea.hbm %s2121_s2, 512 }
  0x26   :  { %s45_s24 = sshll.u32 %s1698_s23, 4  ;;  %p1669_p2 = scmp.ne.s32.totalorder %s2121_s2, %s1668_s28  ;;  %s46_s24 = int_to_ptr.vmem [resolvable:$true] %s45_s24 }
  0x27   :  { %p1672_p3 = scmp.lt.u32.totalorder %s1668_s28, %s2121_s2 }
  0x29   :  { %p1674_p4 = pnand %p1672_p3, %p1669_p2 }
  0x2b   :  { %1677 = shalt.err (!%p1674_p4)
}
  0x2c   :  { %s1678_s5 = scalar_lea.vmem %s46_s24, 512  ;;  %p1683_p6 = scmp.lt.s32.totalorder %s46_s24, %s46_s24 }
  0x2d   :  { %p1679_p5 = scmp.ne.s32.totalorder %s46_s24, %s1678_s5  ;;  %p1684_p7 = scmp.lt.s32.totalorder %s1678_s5, %s1678_s5 }
  0x2f   :  { %p1685_p8 = por %p1684_p7, %p1683_p6 }
  0x31   :  { %p1686_p9 = pnand %p1685_p8, %p1679_p5 }
  0x33   :  { %1689 = shalt.err (!%p1686_p9)
}
  0x34   :  { %48 = dma.hbm_to_vmem [thread:$0]  %s2121_s2, 512, %s46_s24, [#allocation8]  }
  0x35   :  { %1690 = dma.done.wait [#allocation6], 2048  }
  0x36   :  { %1691 = vsyncadd [#allocation6], 4294965248 }
  0x37   :  { %1692 = dma.done.wait [#allocation8], 4608  }
  0x38   :  { %1693 = vsyncadd [#allocation8], 4294962688  ;;  %v1699_v1 = vmov 0   ;;  %v1784_v2 = vld [vmem:[#allocation7 + $0x4] ss:$16 sps:$4 sm:$0xff]   ;;  %v1700_v34 = vmov 0.0|0.0  }
  0x39   :  { %299 = vmatprep.mubr.bf16.mxu0 %v1699_v1  ;;  %340 = vmatprep.mubr.bf16.mxu1 %v1699_v1  ;;  %v1786_v3 = vld [vmem:[#allocation7] ss:$16 sps:$4 sm:$0xff]   ;;  %v1789_v4 = vld [vmem:[#allocation7 + $0x24] ss:$16 sps:$4 sm:$0xff]   ;;  %v1797_v7 = vld [vmem:[#allocation7 + $0xc] ss:$16 sps:$4 sm:$0xff]  }
  0x3a   :  { %267 = vmatprep.subr.bf16.mxu0 %v1784_v2  ;;  %v1792_v5 = vld [vmem:[#allocation7 + $0x20] ss:$16 sps:$4 sm:$0xff]   ;;  %v1795_v6 = vld [vmem:[#allocation7 + $0x44] ss:$16 sps:$4 sm:$0xff]   ;;  %v1799_v8 = vld [vmem:[#allocation7 + $0x8] ss:$16 sps:$4 sm:$0xff]   ;;  %308 = vmatprep.subr.bf16.mxu1 %v1797_v7 }
  0x3b   :  { %268 = vmatpush1.bf16.msra.mxu0 %v1786_v3  ;;  %v1802_v9 = vld [vmem:[#allocation7 + $0x40] ss:$16 sps:$4 sm:$0xff]   ;;  %v1806_v10 = vld [vmem:[#allocation7 + $0x64] ss:$16 sps:$4 sm:$0xff]   ;;  %309 = vmatpush1.bf16.msra.mxu1 %v1799_v8  ;;  %v1809_v11 = vld [vmem:[#allocation7 + $0x2c] ss:$16 sps:$4 sm:$0xff]  }
  0x3c   :  { %269 = vmatprep.subr.bf16.mxu0 %v1789_v4  ;;  %v1811_v12 = vld [vmem:[#allocation7 + $0x28] ss:$16 sps:$4 sm:$0xff]   ;;  %310 = vmatprep.subr.bf16.mxu1 %v1809_v11  ;;  %v1815_v13 = vld [vmem:[#allocation7 + $0x60] ss:$16 sps:$4 sm:$0xff]   ;;  %v1817_v14 = vld [vmem:[#allocation7 + $0x84] ss:$16 sps:$4 sm:$0xff]  }
  0x3d   :  { %v1819_v15 = vld [vmem:[#allocation7 + $0x4c] ss:$16 sps:$4 sm:$0xff]   ;;  %v1823_v16 = vld [vmem:[#allocation7 + $0x48] ss:$16 sps:$4 sm:$0xff]   ;;  %v1829_v18 = vld [vmem:[#allocation7 + $0x80] ss:$16 sps:$4 sm:$0xff]  }
  0x3e   :  { %v1826_v17 = vld [vmem:[#allocation7 + $0x6c] ss:$16 sps:$4 sm:$0xff]   ;;  %v1832_v19 = vld [vmem:[#allocation7 + $0xa4] ss:$16 sps:$4 sm:$0xff]   ;;  %v1835_v20 = vld [vmem:[#allocation7 + $0x68] ss:$16 sps:$4 sm:$0xff]  }
  0x3f   :  { %270 = vmatpush1.bf16.msra.mxu0 %v1792_v5  ;;  %311 = vmatpush1.bf16.msra.mxu1 %v1811_v12  ;;  %v1838_v21 = vld [vmem:[#allocation7 + $0x8c] ss:$16 sps:$4 sm:$0xff]   ;;  %v1841_v22 = vld [vmem:[#allocation7 + $0xa0] ss:$16 sps:$4 sm:$0xff]   ;;  %v1843_v23 = vld [vmem:[#allocation7 + $0xc4] ss:$16 sps:$4 sm:$0xff]  }
  0x40   :  { %271 = vmatprep.subr.bf16.mxu0 %v1795_v6  ;;  %312 = vmatprep.subr.bf16.mxu1 %v1819_v15  ;;  %v1847_v24 = vld [vmem:[#allocation7 + $0x88] ss:$16 sps:$4 sm:$0xff]   ;;  %v1850_v25 = vld [vmem:[#allocation7 + $0xac] ss:$16 sps:$4 sm:$0xff]   ;;  %v1853_v26 = vld [vmem:[#allocation7 + $0xc0] ss:$16 sps:$4 sm:$0xff]  }
  0x41   :  { %v1856_v27 = vld [vmem:[#allocation7 + $0xe4] ss:$16 sps:$4 sm:$0xff]   ;;  %v1859_v28 = vld [vmem:[#allocation7 + $0xa8] ss:$16 sps:$4 sm:$0xff]   ;;  %v1862_v29 = vld [vmem:[#allocation7 + $0xcc] ss:$16 sps:$4 sm:$0xff]  }
  0x42   :  { %v1865_v30 = vld [vmem:[#allocation7 + $0xe0] ss:$16 sps:$4 sm:$0xff]   ;;  %v1869_v31 = vld [vmem:[#allocation7 + $0xc8] ss:$16 sps:$4 sm:$0xff]   ;;  %v1872_v32 = vld [vmem:[#allocation7 + $0xec] ss:$16 sps:$4 sm:$0xff]  }
  0x43   :  { %272 = vmatpush1.bf16.msra.mxu0 %v1802_v9  ;;  %313 = vmatpush1.bf16.msra.mxu1 %v1823_v16  ;;  %v1876_v33 = vld [vmem:[#allocation7 + $0xe8] ss:$16 sps:$4 sm:$0xff]   ;;  %v349_v35 = vld [vmem:[#allocation5] sm:$0xff]  ;;  %vm1323_vm0 = vcmask 7168  }
  0x44   :  { %273 = vmatprep.subr.bf16.mxu0 %v1806_v10  ;;  %314 = vmatprep.subr.bf16.mxu1 %v1826_v17  ;;  %v351_v36 = vunpack.c.l.bf16 %v349_v35  ;;  %v352_v37 = vunpack.c.h.bf16 %v349_v35  ;;  %v350_v39 = vld [vmem:[#allocation5 + $0x8] sm:$0xff] }
  0x45   :  { %v353_v46 = vunpack.c.l.bf16 %v350_v39  ;;  %v354_v52 = vunpack.c.h.bf16 %v350_v39 }
  0x47   :  { %274 = vmatpush1.bf16.msra.mxu0 %v1815_v13  ;;  %315 = vmatpush1.bf16.msra.mxu1 %v1835_v20 }
  0x48   :  { %275 = vmatprep.subr.bf16.mxu0 %v1817_v14  ;;  %316 = vmatprep.subr.bf16.mxu1 %v1838_v21 }
  0x4b   :  { %276 = vmatpush1.bf16.msra.mxu0 %v1829_v18  ;;  %317 = vmatpush1.bf16.msra.mxu1 %v1847_v24 }
  0x4c   :  { %277 = vmatprep.subr.bf16.mxu0 %v1832_v19  ;;  %318 = vmatprep.subr.bf16.mxu1 %v1850_v25 }
  0x4f   :  { %278 = vmatpush1.bf16.msra.mxu0 %v1841_v22  ;;  %319 = vmatpush1.bf16.msra.mxu1 %v1859_v28 }
  0x50   :  { %279 = vmatprep.subr.bf16.mxu0 %v1843_v23  ;;  %320 = vmatprep.subr.bf16.mxu1 %v1862_v29 }
  0x53   :  { %280 = vmatpush1.bf16.msra.mxu0 %v1853_v26  ;;  %321 = vmatpush1.bf16.msra.mxu1 %v1869_v31 }
  0x54   :  { %281 = vmatprep.subr.bf16.mxu0 %v1856_v27  ;;  %322 = vmatprep.subr.bf16.mxu1 %v1872_v32 }
  0x57   :  { %282 = vmatpush1.bf16.msra.mxu0 %v1865_v30  ;;  %323 = vmatpush1.bf16.msra.mxu1 %v1876_v33 }
  0x58   :  { %390 = vmatprep.subr.bf16.mxu0 %v1784_v2  ;;  %431 = vmatprep.subr.bf16.mxu1 %v1797_v7 }
  0x5a   :  { %300 = vmatmul.mubr.bf16.vlgmr.msra.gmra.mrb[0].mxu0 %v1700_v34  ;;  %341 = vmatmul.mubr.bf16.vlgmr.msra.gmra.mrb[0].mxu1 %v1700_v34 }
  0x5b   :  { %391 = vmatpush1.bf16.msra.mxu0 %v1786_v3  ;;  %422 = vmatprep.mubr.bf16.mxu0 %v1699_v1 }
  0x5c   :  { %392 = vmatprep.subr.bf16.mxu0 %v1789_v4  ;;  %432 = vmatpush1.bf16.msra.mxu1 %v1799_v8 }
  0x5d   :  { %433 = vmatprep.subr.bf16.mxu1 %v1809_v11  ;;  %463 = vmatprep.mubr.bf16.mxu1 %v1699_v1 }
  0x5f   :  { %393 = vmatpush1.bf16.msra.mxu0 %v1792_v5 }
  0x60   :  { %394 = vmatprep.subr.bf16.mxu0 %v1795_v6  ;;  %434 = vmatpush1.bf16.msra.mxu1 %v1811_v12 }
  0x61   :  { %435 = vmatprep.subr.bf16.mxu1 %v1819_v15 }
  0x63   :  { %395 = vmatpush1.bf16.msra.mxu0 %v1802_v9 }
  0x64   :  { %396 = vmatprep.subr.bf16.mxu0 %v1806_v10  ;;  %436 = vmatpush1.bf16.msra.mxu1 %v1823_v16 }
  0x65   :  { %437 = vmatprep.subr.bf16.mxu1 %v1826_v17 }
  0x67   :  { %397 = vmatpush1.bf16.msra.mxu0 %v1815_v13 }
  0x68   :  { %398 = vmatprep.subr.bf16.mxu0 %v1817_v14  ;;  %438 = vmatpush1.bf16.msra.mxu1 %v1835_v20 }
  0x69   :  { %439 = vmatprep.subr.bf16.mxu1 %v1838_v21 }
  0x6b   :  { %399 = vmatpush1.bf16.msra.mxu0 %v1829_v18 }
  0x6c   :  { %400 = vmatprep.subr.bf16.mxu0 %v1832_v19  ;;  %440 = vmatpush1.bf16.msra.mxu1 %v1847_v24 }
  0x6d   :  { %441 = vmatprep.subr.bf16.mxu1 %v1850_v25 }
  0x6f   :  { %401 = vmatpush1.bf16.msra.mxu0 %v1841_v22 }
  0x70   :  { %402 = vmatprep.subr.bf16.mxu0 %v1843_v23  ;;  %442 = vmatpush1.bf16.msra.mxu1 %v1859_v28 }
  0x71   :  { %443 = vmatprep.subr.bf16.mxu1 %v1862_v29 }
  0x73   :  { %403 = vmatpush1.bf16.msra.mxu0 %v1853_v26 }
  0x74   :  { %404 = vmatprep.subr.bf16.mxu0 %v1856_v27  ;;  %444 = vmatpush1.bf16.msra.mxu1 %v1869_v31 }
  0x75   :  { %445 = vmatprep.subr.bf16.mxu1 %v1872_v32 }
  0x77   :  { %405 = vmatpush1.bf16.msra.mxu0 %v1865_v30 }
  0x78   :  { %515 = vmatprep.subr.bf16.mxu0 %v1784_v2  ;;  %446 = vmatpush1.bf16.msra.mxu1 %v1876_v33 }
  0x79   :  { %556 = vmatprep.subr.bf16.mxu1 %v1797_v7 }
 0x12d   :  { %v301_v38 = vpop.f32.mrb[0].mxu0  ;;  %v342_v48 = vpop.f32.mrb[0].mxu1 }
 0x12e   :  { %v355_v40 = vadd.f32 %v351_v36, %v301_v38  ;;  %v303_v41 = vpop.f32.mrb[1].mxu0  ;;  %v344_v49 = vpop.f32.mrb[1].mxu1  ;;  %v357_v50 = vadd.f32 %v353_v46, %v342_v48 }
 0x12f   :  { %v356_v42 = vadd.f32 %v352_v37, %v303_v41  ;;  %v305_v43 = vpop.f32.mrb[2].mxu0  ;;  %v346_v51 = vpop.f32.mrb[2].mxu1  ;;  %v358_v55 = vadd.f32 %v354_v52, %v344_v49  ;;  %v473_v41 = vld [vmem:[#allocation5 + $0x10] sm:$0xff]  ;;  %v474_v49 = vld [vmem:[#allocation5 + $0x18] sm:$0xff] }
 0x130   :  { %v1363_v44 = vmul.f32 -1.442695, %v355_v40  ;;  %v306_v45 = vpop.f32.mrb[3].mxu0  ;;  %v347_v53 = vpop.f32.mrb[3].mxu1  ;;  %v1365_v54 = vmul.f32 -1.442695, %v357_v50  ;;  %v476_v43 = vunpack.c.h.bf16 %v473_v41 }
 0x131   :  { %v1364_v47 = vmul.f32 -1.442695, %v356_v42  ;;  %v475_v42 = vunpack.c.l.bf16 %v473_v41 }
 0x132   :  { %1448 = vpow2.f32 %v1363_v44 }
 0x133   :  { %1450 = vpow2.f32 %v1364_v47 }
 0x134   :  { %1452 = vpow2.f32 %v1365_v54 }
 0x135   :  { %1454 = vtanh.f32 %v358_v55 }
 0x13c   :  { %v1449_v56 = vpop.eup %1448 }
 0x13d   :  { %v1451_v57 = vpop.eup %1450  ;;  %v368_v58 = vadd.f32 1.0, %v1449_v56 }
 0x13e   :  { %v369_v59 = vadd.f32 1.0, %v1451_v57  ;;  %v1453_v60 = vpop.eup %1452  ;;  %v477_v57 = vunpack.c.l.bf16 %v474_v49 }
 0x13f   :  { %1456 = vrcp.f32 %v368_v58  ;;  %v1455_v61 = vpop.eup %1454  ;;  %v370_v63 = vadd.f32 1.0, %v1453_v60  ;;  %v478_v58 = vunpack.c.h.bf16 %v474_v49 }
 0x140   :  { %1458 = vrcp.f32 %v369_v59 }
 0x141   :  { %1460 = vrcp.f32 %v370_v63 }
 0x149   :  { %v1457_v62 = vpop.eup %1456 }
 0x14a   :  { %v1459_v0 = vpop.eup %1458  ;;  %v379_v34 = vmul.f32 %v1457_v62, %v1455_v61 }
 0x14b   :  { %v378_v35 = vmul.f32 0.0, %v1459_v0  ;;  %v1461_v37 = vpop.eup %1460 }
 0x14d   :  { %v1916_v36 = vadd.f32 %v379_v34, %v378_v35 }
 0x14f   :  { %1462 = vtanh.f32 %v1916_v36 }
 0x159   :  { %v1463_v38 = vpop.eup %1462 }
 0x15a   :  { %v382_v39 = vmul.f32 %v1463_v38, %v1461_v37 }
 0x15c   :  { %v389_v40 = vpack.c.bf16 %v382_v39, %v382_v39 }
 0x15e   :  { %423 = vmatmul.mubr.bf16.vlgmr.msra.gmra.mrb[4].mxu0 %v389_v40  ;;  %464 = vmatmul.mubr.bf16.vlgmr.msra.gmra.mrb[4].mxu1 %v389_v40 }
 0x15f   :  { %516 = vmatpush1.bf16.msra.mxu0 %v1786_v3  ;;  %557 = vmatpush1.bf16.msra.mxu1 %v1799_v8 }
 0x160   :  { %517 = vmatprep.subr.bf16.mxu0 %v1789_v4  ;;  %558 = vmatprep.subr.bf16.mxu1 %v1809_v11 }
 0x161   :  { %547 = vmatprep.mubr.bf16.mxu0 %v1699_v1  ;;  %588 = vmatprep.mubr.bf16.mxu1 %v1699_v1 }
 0x163   :  { %518 = vmatpush1.bf16.msra.mxu0 %v1792_v5  ;;  %559 = vmatpush1.bf16.msra.mxu1 %v1811_v12 }
 0x164   :  { %519 = vmatprep.subr.bf16.mxu0 %v1795_v6  ;;  %560 = vmatprep.subr.bf16.mxu1 %v1819_v15 }
 0x167   :  { %520 = vmatpush1.bf16.msra.mxu0 %v1802_v9  ;;  %561 = vmatpush1.bf16.msra.mxu1 %v1823_v16 }
 0x168   :  { %521 = vmatprep.subr.bf16.mxu0 %v1806_v10  ;;  %562 = vmatprep.subr.bf16.mxu1 %v1826_v17 }
 0x16b   :  { %522 = vmatpush1.bf16.msra.mxu0 %v1815_v13  ;;  %563 = vmatpush1.bf16.msra.mxu1 %v1835_v20 }
 0x16c   :  { %523 = vmatprep.subr.bf16.mxu0 %v1817_v14  ;;  %564 = vmatprep.subr.bf16.mxu1 %v1838_v21 }
 0x16f   :  { %524 = vmatpush1.bf16.msra.mxu0 %v1829_v18  ;;  %565 = vmatpush1.bf16.msra.mxu1 %v1847_v24 }
 0x170   :  { %525 = vmatprep.subr.bf16.mxu0 %v1832_v19  ;;  %566 = vmatprep.subr.bf16.mxu1 %v1850_v25 }
 0x173   :  { %526 = vmatpush1.bf16.msra.mxu0 %v1841_v22  ;;  %567 = vmatpush1.bf16.msra.mxu1 %v1859_v28 }
 0x174   :  { %527 = vmatprep.subr.bf16.mxu0 %v1843_v23  ;;  %568 = vmatprep.subr.bf16.mxu1 %v1862_v29 }
 0x177   :  { %528 = vmatpush1.bf16.msra.mxu0 %v1853_v26  ;;  %569 = vmatpush1.bf16.msra.mxu1 %v1869_v31 }
 0x178   :  { %529 = vmatprep.subr.bf16.mxu0 %v1856_v27  ;;  %570 = vmatprep.subr.bf16.mxu1 %v1872_v32 }
 0x17b   :  { %530 = vmatpush1.bf16.msra.mxu0 %v1865_v30  ;;  %571 = vmatpush1.bf16.msra.mxu1 %v1876_v33 }
 0x17c   :  { %640 = vmatprep.subr.bf16.mxu0 %v1784_v2  ;;  %681 = vmatprep.subr.bf16.mxu1 %v1797_v7 }
 0x231   :  { %v424_v44 = vpop.f32.mrb[4].mxu0  ;;  %v465_v45 = vpop.f32.mrb[4].mxu1 }
 0x232   :  { %v479_v46 = vadd.f32 %v475_v42, %v424_v44  ;;  %v426_v47 = vpop.f32.mrb[5].mxu0  ;;  %v467_v48 = vpop.f32.mrb[5].mxu1  ;;  %v481_v59 = vadd.f32 %v477_v57, %v465_v45 }
 0x233   :  { %v480_v50 = vadd.f32 %v476_v43, %v426_v47  ;;  %v428_v51 = vpop.f32.mrb[6].mxu0  ;;  %v469_v52 = vpop.f32.mrb[6].mxu1  ;;  %v482_v60 = vadd.f32 %v478_v58, %v467_v48 }
 0x234   :  { %v1366_v53 = vmul.f32 -1.442695, %v479_v46  ;;  %v429_v54 = vpop.f32.mrb[7].mxu0  ;;  %v470_v55 = vpop.f32.mrb[7].mxu1  ;;  %v1368_v61 = vmul.f32 -1.442695, %v481_v59 }
 0x235   :  { %v1367_v56 = vmul.f32 -1.442695, %v480_v50  ;;  %v599_v55 = vld [vmem:[#allocation5 + $0x28] sm:$0xff] }
 0x236   :  { %1464 = vpow2.f32 %v1366_v53 }
 0x237   :  { %1466 = vpow2.f32 %v1367_v56 }
 0x238   :  { %1468 = vtanh.f32 %v482_v60 }
 0x239   :  { %1470 = vpow2.f32 %v1368_v61 }
 0x240   :  { %v1465_v62 = vpop.eup %1464 }
 0x241   :  { %v492_v63 = vadd.f32 1.0, %v1465_v62  ;;  %v1467_v0 = vpop.eup %1466 }
 0x242   :  { %v493_v34 = vadd.f32 1.0, %v1467_v0  ;;  %v1469_v35 = vpop.eup %1468  ;;  %v603_v0 = vunpack.c.h.bf16 %v599_v55 }
 0x243   :  { %1472 = vrcp.f32 %v492_v63  ;;  %v1471_v37 = vpop.eup %1470  ;;  %v602_v63 = vunpack.c.l.bf16 %v599_v55 }
 0x244   :  { %1474 = vrcp.f32 %v493_v34  ;;  %v494_v41 = vadd.f32 1.0, %v1471_v37 }
 0x246   :  { %1476 = vrcp.f32 %v494_v41 }
 0x24d   :  { %v1473_v38 = vpop.eup %1472 }
 0x24e   :  { %v503_v39 = vmul.f32 %v1473_v38, %v1469_v35  ;;  %v1475_v40 = vpop.eup %1474 }
 0x24f   :  { %v502_v42 = vmul.f32 %v1475_v40, %v1916_v36  ;;  %v598_v36 = vld [vmem:[#allocation5 + $0x20] sm:$0xff] }
 0x250   :  { %v1477_v44 = vpop.eup %1476  ;;  %v600_v48 = vunpack.c.l.bf16 %v598_v36  ;;  %v601_v49 = vunpack.c.h.bf16 %v598_v36 }
 0x251   :  { %v1954_v43 = vadd.f32 %v503_v39, %v502_v42 }
 0x253   :  { %1478 = vtanh.f32 %v1954_v43 }
 0x25d   :  { %v1479_v45 = vpop.eup %1478 }
 0x25e   :  { %v506_v46 = vmul.f32 %v1479_v45, %v1477_v44 }
 0x260   :  { %v514_v47 = vpack.c.bf16 %v506_v46, %v506_v46 }
 0x262   :  { %548 = vmatmul.mubr.bf16.vlgmr.msra.gmra.mrb[8].mxu0 %v514_v47  ;;  %589 = vmatmul.mubr.bf16.vlgmr.msra.gmra.mrb[8].mxu1 %v514_v47 }
 0x263   :  { %641 = vmatpush1.bf16.msra.mxu0 %v1786_v3  ;;  %682 = vmatpush1.bf16.msra.mxu1 %v1799_v8 }
 0x264   :  { %642 = vmatprep.subr.bf16.mxu0 %v1789_v4  ;;  %683 = vmatprep.subr.bf16.mxu1 %v1809_v11 }
 0x265   :  { %672 = vmatprep.mubr.bf16.mxu0 %v1699_v1  ;;  %713 = vmatprep.mubr.bf16.mxu1 %v1699_v1 }
 0x267   :  { %643 = vmatpush1.bf16.msra.mxu0 %v1792_v5  ;;  %684 = vmatpush1.bf16.msra.mxu1 %v1811_v12 }
 0x268   :  { %644 = vmatprep.subr.bf16.mxu0 %v1795_v6  ;;  %685 = vmatprep.subr.bf16.mxu1 %v1819_v15 }
 0x26b   :  { %645 = vmatpush1.bf16.msra.mxu0 %v1802_v9  ;;  %686 = vmatpush1.bf16.msra.mxu1 %v1823_v16 }
 0x26c   :  { %646 = vmatprep.subr.bf16.mxu0 %v1806_v10  ;;  %687 = vmatprep.subr.bf16.mxu1 %v1826_v17 }
 0x26f   :  { %647 = vmatpush1.bf16.msra.mxu0 %v1815_v13  ;;  %688 = vmatpush1.bf16.msra.mxu1 %v1835_v20 }
 0x270   :  { %648 = vmatprep.subr.bf16.mxu0 %v1817_v14  ;;  %689 = vmatprep.subr.bf16.mxu1 %v1838_v21 }
 0x273   :  { %649 = vmatpush1.bf16.msra.mxu0 %v1829_v18  ;;  %690 = vmatpush1.bf16.msra.mxu1 %v1847_v24 }
 0x274   :  { %650 = vmatprep.subr.bf16.mxu0 %v1832_v19  ;;  %691 = vmatprep.subr.bf16.mxu1 %v1850_v25 }
 0x277   :  { %651 = vmatpush1.bf16.msra.mxu0 %v1841_v22  ;;  %692 = vmatpush1.bf16.msra.mxu1 %v1859_v28 }
 0x278   :  { %652 = vmatprep.subr.bf16.mxu0 %v1843_v23  ;;  %693 = vmatprep.subr.bf16.mxu1 %v1862_v29 }
 0x27b   :  { %653 = vmatpush1.bf16.msra.mxu0 %v1853_v26  ;;  %694 = vmatpush1.bf16.msra.mxu1 %v1869_v31 }
 0x27c   :  { %654 = vmatprep.subr.bf16.mxu0 %v1856_v27  ;;  %695 = vmatprep.subr.bf16.mxu1 %v1872_v32 }
 0x27f   :  { %655 = vmatpush1.bf16.msra.mxu0 %v1865_v30  ;;  %696 = vmatpush1.bf16.msra.mxu1 %v1876_v33 }
 0x280   :  { %765 = vmatprep.subr.bf16.mxu0 %v1784_v2  ;;  %806 = vmatprep.subr.bf16.mxu1 %v1797_v7 }
 0x335   :  { %v549_v50 = vpop.f32.mrb[8].mxu0  ;;  %v590_v51 = vpop.f32.mrb[8].mxu1 }
 0x336   :  { %v604_v52 = vadd.f32 %v600_v48, %v549_v50  ;;  %v551_v53 = vpop.f32.mrb[9].mxu0  ;;  %v592_v54 = vpop.f32.mrb[9].mxu1  ;;  %v606_v34 = vadd.f32 %v602_v63, %v590_v51 }
 0x337   :  { %v605_v56 = vadd.f32 %v601_v49, %v551_v53  ;;  %v553_v57 = vpop.f32.mrb[10].mxu0  ;;  %v594_v58 = vpop.f32.mrb[10].mxu1  ;;  %v607_v35 = vadd.f32 %v603_v0, %v592_v54 }
 0x338   :  { %v1369_v59 = vmul.f32 -1.442695, %v604_v52  ;;  %v554_v60 = vpop.f32.mrb[11].mxu0  ;;  %v595_v61 = vpop.f32.mrb[11].mxu1  ;;  %v1371_v37 = vmul.f32 -1.442695, %v606_v34 }
 0x339   :  { %v1370_v62 = vmul.f32 -1.442695, %v605_v56  ;;  %v724_v61 = vld [vmem:[#allocation5 + $0x38] sm:$0xff] }
 0x33a   :  { %1480 = vpow2.f32 %v1369_v59 }
 0x33b   :  { %1482 = vpow2.f32 %v1370_v62 }
 0x33c   :  { %1484 = vtanh.f32 %v607_v35 }
 0x33d   :  { %1486 = vpow2.f32 %v1371_v37 }
 0x344   :  { %v1481_v38 = vpop.eup %1480 }
 0x345   :  { %v617_v39 = vadd.f32 1.0, %v1481_v38  ;;  %v1483_v40 = vpop.eup %1482 }
 0x346   :  { %v618_v41 = vadd.f32 1.0, %v1483_v40  ;;  %v1485_v42 = vpop.eup %1484  ;;  %v728_v40 = vunpack.c.h.bf16 %v724_v61 }
 0x347   :  { %1488 = vrcp.f32 %v617_v39  ;;  %v1487_v44 = vpop.eup %1486  ;;  %v727_v39 = vunpack.c.l.bf16 %v724_v61 }
 0x348   :  { %1490 = vrcp.f32 %v618_v41  ;;  %v619_v36 = vadd.f32 1.0, %v1487_v44 }
 0x34a   :  { %1492 = vrcp.f32 %v619_v36 }
 0x351   :  { %v1489_v45 = vpop.eup %1488 }
 0x352   :  { %v628_v46 = vmul.f32 %v1489_v45, %v1485_v42  ;;  %v1491_v47 = vpop.eup %1490 }
 0x353   :  { %v627_v48 = vmul.f32 %v1491_v47, %v1954_v43  ;;  %v723_v43 = vld [vmem:[#allocation5 + $0x30] sm:$0xff] }
 0x354   :  { %v1493_v50 = vpop.eup %1492  ;;  %v725_v54 = vunpack.c.l.bf16 %v723_v43  ;;  %v726_v55 = vunpack.c.h.bf16 %v723_v43 }
 0x355   :  { %v1992_v49 = vadd.f32 %v628_v46, %v627_v48 }
 0x357   :  { %1494 = vtanh.f32 %v1992_v49 }
 0x361   :  { %v1495_v51 = vpop.eup %1494 }
 0x362   :  { %v631_v52 = vmul.f32 %v1495_v51, %v1493_v50 }
 0x364   :  { %v639_v53 = vpack.c.bf16 %v631_v52, %v631_v52 }
 0x366   :  { %673 = vmatmul.mubr.bf16.vlgmr.msra.gmra.mrb[12].mxu0 %v639_v53  ;;  %714 = vmatmul.mubr.bf16.vlgmr.msra.gmra.mrb[12].mxu1 %v639_v53 }
 0x367   :  { %766 = vmatpush1.bf16.msra.mxu0 %v1786_v3  ;;  %807 = vmatpush1.bf16.msra.mxu1 %v1799_v8 }
 0x368   :  { %767 = vmatprep.subr.bf16.mxu0 %v1789_v4  ;;  %808 = vmatprep.subr.bf16.mxu1 %v1809_v11 }
 0x369   :  { %797 = vmatprep.mubr.bf16.mxu0 %v1699_v1  ;;  %838 = vmatprep.mubr.bf16.mxu1 %v1699_v1 }
 0x36b   :  { %768 = vmatpush1.bf16.msra.mxu0 %v1792_v5  ;;  %809 = vmatpush1.bf16.msra.mxu1 %v1811_v12 }
 0x36c   :  { %769 = vmatprep.subr.bf16.mxu0 %v1795_v6  ;;  %810 = vmatprep.subr.bf16.mxu1 %v1819_v15 }
 0x36f   :  { %770 = vmatpush1.bf16.msra.mxu0 %v1802_v9  ;;  %811 = vmatpush1.bf16.msra.mxu1 %v1823_v16 }
 0x370   :  { %771 = vmatprep.subr.bf16.mxu0 %v1806_v10  ;;  %812 = vmatprep.subr.bf16.mxu1 %v1826_v17 }
 0x373   :  { %772 = vmatpush1.bf16.msra.mxu0 %v1815_v13  ;;  %813 = vmatpush1.bf16.msra.mxu1 %v1835_v20 }
 0x374   :  { %773 = vmatprep.subr.bf16.mxu0 %v1817_v14  ;;  %814 = vmatprep.subr.bf16.mxu1 %v1838_v21 }
 0x377   :  { %774 = vmatpush1.bf16.msra.mxu0 %v1829_v18  ;;  %815 = vmatpush1.bf16.msra.mxu1 %v1847_v24 }
 0x378   :  { %775 = vmatprep.subr.bf16.mxu0 %v1832_v19  ;;  %816 = vmatprep.subr.bf16.mxu1 %v1850_v25 }
 0x37b   :  { %776 = vmatpush1.bf16.msra.mxu0 %v1841_v22  ;;  %817 = vmatpush1.bf16.msra.mxu1 %v1859_v28 }
 0x37c   :  { %777 = vmatprep.subr.bf16.mxu0 %v1843_v23  ;;  %818 = vmatprep.subr.bf16.mxu1 %v1862_v29 }
 0x37f   :  { %778 = vmatpush1.bf16.msra.mxu0 %v1853_v26  ;;  %819 = vmatpush1.bf16.msra.mxu1 %v1869_v31 }
 0x380   :  { %779 = vmatprep.subr.bf16.mxu0 %v1856_v27  ;;  %820 = vmatprep.subr.bf16.mxu1 %v1872_v32 }
 0x383   :  { %780 = vmatpush1.bf16.msra.mxu0 %v1865_v30  ;;  %821 = vmatpush1.bf16.msra.mxu1 %v1876_v33 }
 0x384   :  { %890 = vmatprep.subr.bf16.mxu0 %v1784_v2  ;;  %931 = vmatprep.subr.bf16.mxu1 %v1797_v7 }
 0x439   :  { %v674_v56 = vpop.f32.mrb[12].mxu0  ;;  %v715_v57 = vpop.f32.mrb[12].mxu1 }
 0x43a   :  { %v729_v58 = vadd.f32 %v725_v54, %v674_v56  ;;  %v676_v59 = vpop.f32.mrb[13].mxu0  ;;  %v717_v60 = vpop.f32.mrb[13].mxu1  ;;  %v731_v41 = vadd.f32 %v727_v39, %v715_v57 }
 0x43b   :  { %v730_v62 = vadd.f32 %v726_v55, %v676_v59  ;;  %v678_v63 = vpop.f32.mrb[14].mxu0  ;;  %v719_v0 = vpop.f32.mrb[14].mxu1  ;;  %v732_v42 = vadd.f32 %v728_v40, %v717_v60 }
 0x43c   :  { %v1372_v34 = vmul.f32 -1.442695, %v729_v58  ;;  %v679_v35 = vpop.f32.mrb[15].mxu0  ;;  %v720_v37 = vpop.f32.mrb[15].mxu1  ;;  %v1374_v44 = vmul.f32 -1.442695, %v731_v41 }
 0x43d   :  { %v1373_v38 = vmul.f32 -1.442695, %v730_v62  ;;  %v849_v37 = vld [vmem:[#allocation5 + $0x48] sm:$0xff] }
 0x43e   :  { %1496 = vpow2.f32 %v1372_v34 }
 0x43f   :  { %1498 = vpow2.f32 %v1373_v38 }
 0x440   :  { %1500 = vtanh.f32 %v732_v42 }
 0x441   :  { %1502 = vpow2.f32 %v1374_v44 }
 0x448   :  { %v1497_v45 = vpop.eup %1496 }
 0x449   :  { %v742_v46 = vadd.f32 1.0, %v1497_v45  ;;  %v1499_v47 = vpop.eup %1498 }
 0x44a   :  { %v743_v36 = vadd.f32 1.0, %v1499_v47  ;;  %v1501_v48 = vpop.eup %1500 }
 0x44b   :  { %1504 = vrcp.f32 %v742_v46  ;;  %v1503_v50 = vpop.eup %1502 }
 0x44c   :  { %1506 = vrcp.f32 %v743_v36  ;;  %v744_v43 = vadd.f32 1.0, %v1503_v50 }
 0x44e   :  { %1508 = vrcp.f32 %v744_v43 }
 0x455   :  { %v1505_v51 = vpop.eup %1504 }
 0x456   :  { %v753_v52 = vmul.f32 %v1505_v51, %v1501_v48  ;;  %v1507_v53 = vpop.eup %1506 }
 0x457   :  { %v752_v54 = vmul.f32 %v1507_v53, %v1992_v49  ;;  %v848_v49 = vld [vmem:[#allocation5 + $0x40] sm:$0xff] }
 0x458   :  { %v1509_v56 = vpop.eup %1508  ;;  %v850_v60 = vunpack.c.l.bf16 %v848_v49  ;;  %v851_v61 = vunpack.c.h.bf16 %v848_v49 }
 0x459   :  { %v2030_v55 = vadd.f32 %v753_v52, %v752_v54 }
 0x45b   :  { %1510 = vtanh.f32 %v2030_v55 }
 0x465   :  { %v1511_v57 = vpop.eup %1510 }
 0x466   :  { %v756_v58 = vmul.f32 %v1511_v57, %v1509_v56 }
 0x468   :  { %v764_v59 = vpack.c.bf16 %v756_v58, %v756_v58 }
 0x46a   :  { %798 = vmatmul.mubr.bf16.vlgmr.msra.gmra.mrb[16].mxu0 %v764_v59  ;;  %839 = vmatmul.mubr.bf16.vlgmr.msra.gmra.mrb[16].mxu1 %v764_v59 }
 0x46b   :  { %891 = vmatpush1.bf16.msra.mxu0 %v1786_v3  ;;  %932 = vmatpush1.bf16.msra.mxu1 %v1799_v8 }
 0x46c   :  { %892 = vmatprep.subr.bf16.mxu0 %v1789_v4  ;;  %933 = vmatprep.subr.bf16.mxu1 %v1809_v11 }
 0x46d   :  { %922 = vmatprep.mubr.bf16.mxu0 %v1699_v1  ;;  %963 = vmatprep.mubr.bf16.mxu1 %v1699_v1 }
 0x46f   :  { %893 = vmatpush1.bf16.msra.mxu0 %v1792_v5  ;;  %934 = vmatpush1.bf16.msra.mxu1 %v1811_v12 }
 0x470   :  { %894 = vmatprep.subr.bf16.mxu0 %v1795_v6  ;;  %935 = vmatprep.subr.bf16.mxu1 %v1819_v15 }
 0x473   :  { %895 = vmatpush1.bf16.msra.mxu0 %v1802_v9  ;;  %936 = vmatpush1.bf16.msra.mxu1 %v1823_v16 }
 0x474   :  { %896 = vmatprep.subr.bf16.mxu0 %v1806_v10  ;;  %937 = vmatprep.subr.bf16.mxu1 %v1826_v17 }
 0x477   :  { %897 = vmatpush1.bf16.msra.mxu0 %v1815_v13  ;;  %938 = vmatpush1.bf16.msra.mxu1 %v1835_v20 }
 0x478   :  { %898 = vmatprep.subr.bf16.mxu0 %v1817_v14  ;;  %939 = vmatprep.subr.bf16.mxu1 %v1838_v21 }
 0x47b   :  { %899 = vmatpush1.bf16.msra.mxu0 %v1829_v18  ;;  %940 = vmatpush1.bf16.msra.mxu1 %v1847_v24 }
 0x47c   :  { %900 = vmatprep.subr.bf16.mxu0 %v1832_v19  ;;  %941 = vmatprep.subr.bf16.mxu1 %v1850_v25 }
 0x47f   :  { %901 = vmatpush1.bf16.msra.mxu0 %v1841_v22  ;;  %942 = vmatpush1.bf16.msra.mxu1 %v1859_v28 }
 0x480   :  { %902 = vmatprep.subr.bf16.mxu0 %v1843_v23  ;;  %943 = vmatprep.subr.bf16.mxu1 %v1862_v29 }
 0x483   :  { %903 = vmatpush1.bf16.msra.mxu0 %v1853_v26  ;;  %944 = vmatpush1.bf16.msra.mxu1 %v1869_v31 }
 0x484   :  { %904 = vmatprep.subr.bf16.mxu0 %v1856_v27  ;;  %945 = vmatprep.subr.bf16.mxu1 %v1872_v32 }
 0x487   :  { %905 = vmatpush1.bf16.msra.mxu0 %v1865_v30  ;;  %946 = vmatpush1.bf16.msra.mxu1 %v1876_v33 }
 0x488   :  { %1015 = vmatprep.subr.bf16.mxu0 %v1784_v2  ;;  %1056 = vmatprep.subr.bf16.mxu1 %v1797_v7  ;;  %v852_v2 = vunpack.c.l.bf16 %v849_v37  ;;  %v853_v7 = vunpack.c.h.bf16 %v849_v37 }
 0x53d   :  { %v799_v62 = vpop.f32.mrb[16].mxu0  ;;  %v840_v63 = vpop.f32.mrb[16].mxu1 }
 0x53e   :  { %v854_v0 = vadd.f32 %v850_v60, %v799_v62  ;;  %v801_v34 = vpop.f32.mrb[17].mxu0  ;;  %v842_v35 = vpop.f32.mrb[17].mxu1  ;;  %v856_v46 = vadd.f32 %v852_v2, %v840_v63  ;;  %v1597_v2 = vld [vmem:[#allocation7 + $0x2c] ss:$16 sps:$4 sm:$0xff]  }
 0x53f   :  { %v855_v38 = vadd.f32 %v851_v61, %v801_v34  ;;  %v803_v39 = vpop.f32.mrb[18].mxu0  ;;  %v844_v40 = vpop.f32.mrb[18].mxu1  ;;  %v857_v47 = vadd.f32 %v853_v7, %v842_v35  ;;  %v1598_v7 = vld [vmem:[#allocation7 + $0x20] ss:$16 sps:$4 sm:$0xff]  }
 0x540   :  { %v1375_v41 = vmul.f32 -1.442695, %v854_v0  ;;  %v804_v42 = vpop.f32.mrb[19].mxu0  ;;  %v845_v44 = vpop.f32.mrb[19].mxu1  ;;  %v1377_v36 = vmul.f32 -1.442695, %v856_v46 }
 0x541   :  { %v1376_v45 = vmul.f32 -1.442695, %v855_v38  ;;  %v1594_v42 = vld [vmem:[#allocation7] ss:$16 sps:$4 sm:$0xff]   ;;  %v1595_v44 = vld [vmem:[#allocation7 + $0x8] ss:$16 sps:$4 sm:$0xff]  }
 0x542   :  { %1512 = vpow2.f32 %v1375_v41  ;;  %v1599_v46 = vld [vmem:[#allocation7 + $0x28] ss:$16 sps:$4 sm:$0xff]  }
 0x543   :  { %1514 = vpow2.f32 %v1376_v45  ;;  %v1596_v45 = vld [vmem:[#allocation7 + $0x24] ss:$16 sps:$4 sm:$0xff]  }
 0x544   :  { %1516 = vtanh.f32 %v857_v47  ;;  %v1600_v47 = vld [vmem:[#allocation7 + $0x44] ss:$16 sps:$4 sm:$0xff]  }
 0x545   :  { %1518 = vpow2.f32 %v1377_v36  ;;  %v1601_v36 = vld [vmem:[#allocation7 + $0x4c] ss:$16 sps:$4 sm:$0xff]  }
 0x54c   :  { %v1513_v48 = vpop.eup %1512 }
 0x54d   :  { %v867_v50 = vadd.f32 1.0, %v1513_v48  ;;  %v1515_v51 = vpop.eup %1514  ;;  %v1602_v48 = vld [vmem:[#allocation7 + $0x40] ss:$16 sps:$4 sm:$0xff]  }
 0x54e   :  { %v868_v52 = vadd.f32 1.0, %v1515_v51  ;;  %v1517_v53 = vpop.eup %1516  ;;  %v1604_v51 = vld [vmem:[#allocation7 + $0x64] ss:$16 sps:$4 sm:$0xff]  }
 0x54f   :  { %1520 = vrcp.f32 %v867_v50  ;;  %v1519_v43 = vpop.eup %1518  ;;  %v1603_v50 = vld [vmem:[#allocation7 + $0x48] ss:$16 sps:$4 sm:$0xff]  }
 0x550   :  { %1522 = vrcp.f32 %v868_v52  ;;  %v869_v58 = vadd.f32 1.0, %v1519_v43  ;;  %v1605_v52 = vld [vmem:[#allocation7 + $0x6c] ss:$16 sps:$4 sm:$0xff]   ;;  %v1607_v43 = vld [vmem:[#allocation7 + $0x68] ss:$16 sps:$4 sm:$0xff]  }
 0x552   :  { %1524 = vrcp.f32 %v869_v58  ;;  %v1612_v58 = vld [vmem:[#allocation7 + $0xa4] ss:$16 sps:$4 sm:$0xff]  }
 0x559   :  { %v1521_v54 = vpop.eup %1520 }
 0x55a   :  { %v878_v56 = vmul.f32 %v1521_v54, %v1517_v53  ;;  %v1523_v57 = vpop.eup %1522  ;;  %v1606_v53 = vld [vmem:[#allocation7 + $0x60] ss:$16 sps:$4 sm:$0xff]   ;;  %v1609_v54 = vld [vmem:[#allocation7 + $0x8c] ss:$16 sps:$4 sm:$0xff]  }
 0x55b   :  { %v877_v59 = vmul.f32 %v1523_v57, %v2030_v55  ;;  %v1611_v57 = vld [vmem:[#allocation7 + $0x88] ss:$16 sps:$4 sm:$0xff]  }
 0x55c   :  { %v1525_v60 = vpop.eup %1524 }
 0x55d   :  { %v2068_v49 = vadd.f32 %v878_v56, %v877_v59  ;;  %v1610_v56 = vld [vmem:[#allocation7 + $0x80] ss:$16 sps:$4 sm:$0xff]   ;;  %v1613_v59 = vld [vmem:[#allocation7 + $0xac] ss:$16 sps:$4 sm:$0xff]  }
 0x55f   :  { %1526 = vtanh.f32 %v2068_v49 }
 0x569   :  { %v1527_v61 = vpop.eup %1526 }
 0x56a   :  { %v881_v62 = vmul.f32 %v1527_v61, %v1525_v60  ;;  %v1615_v60 = vld [vmem:[#allocation7 + $0xa8] ss:$16 sps:$4 sm:$0xff]   ;;  %v1616_v61 = vld [vmem:[#allocation7 + $0xc4] ss:$16 sps:$4 sm:$0xff]  }
 0x56c   :  { %v889_v63 = vpack.c.bf16 %v881_v62, %v881_v62  ;;  %v1617_v62 = vld [vmem:[#allocation7 + $0xcc] ss:$16 sps:$4 sm:$0xff]  }
 0x56e   :  { %923 = vmatmul.mubr.bf16.vlgmr.msra.gmra.mrb[20].mxu0 %v889_v63  ;;  %964 = vmatmul.mubr.bf16.vlgmr.msra.gmra.mrb[20].mxu1 %v889_v63  ;;  %v1618_v63 = vld [vmem:[#allocation7 + $0xc0] ss:$16 sps:$4 sm:$0xff]  }
 0x56f   :  { %1016 = vmatpush1.bf16.msra.mxu0 %v1786_v3  ;;  %1057 = vmatpush1.bf16.msra.mxu1 %v1799_v8  ;;  %v1592_v3 = vld [vmem:[#allocation7 + $0x4] ss:$16 sps:$4 sm:$0xff]  }
 0x570   :  { %1017 = vmatprep.subr.bf16.mxu0 %v1789_v4  ;;  %1058 = vmatprep.subr.bf16.mxu1 %v1809_v11  ;;  %v1593_v4 = vld [vmem:[#allocation7 + $0xc] ss:$16 sps:$4 sm:$0xff]  }
 0x571   :  { %1047 = vmatprep.mubr.bf16.mxu0 %v1699_v1  ;;  %1088 = vmatprep.mubr.bf16.mxu1 %v1699_v1 }
 0x573   :  { %1018 = vmatpush1.bf16.msra.mxu0 %v1792_v5  ;;  %1059 = vmatpush1.bf16.msra.mxu1 %v1811_v12  ;;  %v973_v5 = vld [vmem:[#allocation5 + $0x50] sm:$0xff] }
 0x574   :  { %1019 = vmatprep.subr.bf16.mxu0 %v1795_v6  ;;  %1060 = vmatprep.subr.bf16.mxu1 %v1819_v15  ;;  %v975_v6 = vunpack.c.l.bf16 %v973_v5  ;;  %v976_v8 = vunpack.c.h.bf16 %v973_v5  ;;  %v1621_v5 = vld [vmem:[#allocation7 + $0xec] ss:$16 sps:$4 sm:$0xff]  }
 0x577   :  { %1020 = vmatpush1.bf16.msra.mxu0 %v1802_v9  ;;  %1061 = vmatpush1.bf16.msra.mxu1 %v1823_v16 }
 0x578   :  { %1021 = vmatprep.subr.bf16.mxu0 %v1806_v10  ;;  %1062 = vmatprep.subr.bf16.mxu1 %v1826_v17 }
 0x57b   :  { %1022 = vmatpush1.bf16.msra.mxu0 %v1815_v13  ;;  %1063 = vmatpush1.bf16.msra.mxu1 %v1835_v20 }
 0x57c   :  { %1023 = vmatprep.subr.bf16.mxu0 %v1817_v14  ;;  %1064 = vmatprep.subr.bf16.mxu1 %v1838_v21  ;;  %v974_v14 = vld [vmem:[#allocation5 + $0x58] sm:$0xff] }
 0x57f   :  { %1024 = vmatpush1.bf16.msra.mxu0 %v1829_v18  ;;  %1065 = vmatpush1.bf16.msra.mxu1 %v1847_v24 }
 0x580   :  { %1025 = vmatprep.subr.bf16.mxu0 %v1832_v19  ;;  %1066 = vmatprep.subr.bf16.mxu1 %v1850_v25 }
 0x583   :  { %1026 = vmatpush1.bf16.msra.mxu0 %v1841_v22  ;;  %1067 = vmatpush1.bf16.msra.mxu1 %v1859_v28  ;;  %v977_v22 = vunpack.c.l.bf16 %v974_v14 }
 0x584   :  { %1027 = vmatprep.subr.bf16.mxu0 %v1843_v23  ;;  %1068 = vmatprep.subr.bf16.mxu1 %v1862_v29  ;;  %v978_v23 = vunpack.c.h.bf16 %v974_v14 }
 0x587   :  { %1028 = vmatpush1.bf16.msra.mxu0 %v1853_v26  ;;  %1069 = vmatpush1.bf16.msra.mxu1 %v1869_v31 }
 0x588   :  { %1029 = vmatprep.subr.bf16.mxu0 %v1856_v27  ;;  %1070 = vmatprep.subr.bf16.mxu1 %v1872_v32 }
 0x58b   :  { %1030 = vmatpush1.bf16.msra.mxu0 %v1865_v30  ;;  %1071 = vmatpush1.bf16.msra.mxu1 %v1876_v33 }
 0x58c   :  { %1140 = vmatprep.subr.bf16.mxu0 %v1592_v3  ;;  %1181 = vmatprep.subr.bf16.mxu1 %v1593_v4  ;;  %v1619_v3 = vld [vmem:[#allocation7 + $0xc8] ss:$16 sps:$4 sm:$0xff]   ;;  %v1620_v4 = vld [vmem:[#allocation7 + $0xe4] ss:$16 sps:$4 sm:$0xff]  }
 0x641   :  { %v924_v9 = vpop.f32.mrb[20].mxu0  ;;  %v965_v10 = vpop.f32.mrb[20].mxu1 }
 0x642   :  { %v979_v11 = vadd.f32 %v975_v6, %v924_v9  ;;  %v926_v12 = vpop.f32.mrb[21].mxu0  ;;  %v967_v13 = vpop.f32.mrb[21].mxu1  ;;  %v981_v24 = vadd.f32 %v977_v22, %v965_v10  ;;  %v1622_v6 = vld [vmem:[#allocation7 + $0xe0] ss:$16 sps:$4 sm:$0xff]  }
 0x643   :  { %v980_v15 = vadd.f32 %v976_v8, %v926_v12  ;;  %v928_v16 = vpop.f32.mrb[22].mxu0  ;;  %v969_v17 = vpop.f32.mrb[22].mxu1  ;;  %v982_v25 = vadd.f32 %v978_v23, %v967_v13  ;;  %v1623_v8 = vld [vmem:[#allocation7 + $0xe8] ss:$16 sps:$4 sm:$0xff]   ;;  %v1098_v9 = vld [vmem:[#allocation5 + $0x60] sm:$0xff] }
 0x644   :  { %v1378_v18 = vmul.f32 -1.442695, %v979_v11  ;;  %v929_v19 = vpop.f32.mrb[23].mxu0  ;;  %v970_v20 = vpop.f32.mrb[23].mxu1  ;;  %v1380_v26 = vmul.f32 -1.442695, %v981_v24  ;;  %v1100_v10 = vunpack.c.l.bf16 %v1098_v9  ;;  %v1101_v11 = vunpack.c.h.bf16 %v1098_v9 }
 0x645   :  { %v1379_v21 = vmul.f32 -1.442695, %v980_v15  ;;  %v1099_v17 = vld [vmem:[#allocation5 + $0x68] sm:$0xff] }
 0x646   :  { %1528 = vpow2.f32 %v1378_v18 }
 0x647   :  { %1530 = vpow2.f32 %v1379_v21 }
 0x648   :  { %1532 = vtanh.f32 %v982_v25  ;;  %v1102_v25 = vunpack.c.l.bf16 %v1099_v17 }
 0x649   :  { %1534 = vpow2.f32 %v1380_v26  ;;  %v1103_v26 = vunpack.c.h.bf16 %v1099_v17 }
 0x650   :  { %v1529_v27 = vpop.eup %1528 }
 0x651   :  { %v992_v28 = vadd.f32 1.0, %v1529_v27  ;;  %v1531_v29 = vpop.eup %1530 }
 0x652   :  { %v993_v30 = vadd.f32 1.0, %v1531_v29  ;;  %v1533_v31 = vpop.eup %1532 }
 0x653   :  { %1536 = vrcp.f32 %v992_v28  ;;  %v1535_v32 = vpop.eup %1534 }
 0x654   :  { %1538 = vrcp.f32 %v993_v30  ;;  %v994_v34 = vadd.f32 1.0, %v1535_v32 }
 0x656   :  { %1540 = vrcp.f32 %v994_v34 }
 0x65d   :  { %v1537_v33 = vpop.eup %1536 }
 0x65e   :  { %v1003_v55 = vmul.f32 %v1537_v33, %v1533_v31  ;;  %v1539_v0 = vpop.eup %1538 }
 0x65f   :  { %v1002_v35 = vmul.f32 %v1539_v0, %v2068_v49  ;;  %v1614_v49 = vld [vmem:[#allocation7 + $0xa0] ss:$16 sps:$4 sm:$0xff]  }
 0x660   :  { %v1541_v38 = vpop.eup %1540 }
 0x661   :  { %v2104_v37 = vadd.f32 %v1003_v55, %v1002_v35 }
 0x663   :  { %1542 = vtanh.f32 %v2104_v37 }
 0x66d   :  { %v1543_v39 = vpop.eup %1542 }
 0x66e   :  { %v1006_v40 = vmul.f32 %v1543_v39, %v1541_v38 }
 0x670   :  { %v1014_v41 = vpack.c.bf16 %v1006_v40, %v1006_v40 }
 0x672   :  { %1048 = vmatmul.mubr.bf16.vlgmr.msra.gmra.mrb[24].mxu0 %v1014_v41  ;;  %1089 = vmatmul.mubr.bf16.vlgmr.msra.gmra.mrb[24].mxu1 %v1014_v41 }
 0x673   :  { %1141 = vmatpush1.bf16.msra.mxu0 %v1594_v42  ;;  %1182 = vmatpush1.bf16.msra.mxu1 %v1595_v44 }
 0x674   :  { %1142 = vmatprep.subr.bf16.mxu0 %v1596_v45  ;;  %1183 = vmatprep.subr.bf16.mxu1 %v1597_v2 }
 0x675   :  { %1172 = vmatprep.mubr.bf16.mxu0 %v1699_v1  ;;  %1213 = vmatprep.mubr.bf16.mxu1 %v1699_v1  ;;  %v1608_v1 = vld [vmem:[#allocation7 + $0x84] ss:$16 sps:$4 sm:$0xff]  }
 0x677   :  { %1143 = vmatpush1.bf16.msra.mxu0 %v1598_v7  ;;  %1184 = vmatpush1.bf16.msra.mxu1 %v1599_v46  ;;  %v1269_v7 = vld [vmem:[#allocation9] sm:$0xff] }
 0x678   :  { %1144 = vmatprep.subr.bf16.mxu0 %v1600_v47  ;;  %1185 = vmatprep.subr.bf16.mxu1 %v1601_v36  ;;  %v1387_v46 = vmul.f32 -1.442695, %v1269_v7  ;;  %v1223_v47 = vld [vmem:[#allocation5 + $0x70] sm:$0xff] }
 0x679   :  { %v1225_v36 = vunpack.c.l.bf16 %v1223_v47 }
 0x67b   :  { %1145 = vmatpush1.bf16.msra.mxu0 %v1602_v48  ;;  %1186 = vmatpush1.bf16.msra.mxu1 %v1603_v50  ;;  %v1226_v48 = vunpack.c.h.bf16 %v1223_v47 }
 0x67c   :  { %1146 = vmatprep.subr.bf16.mxu0 %v1604_v51  ;;  %1187 = vmatprep.subr.bf16.mxu1 %v1605_v52 }
 0x67f   :  { %1147 = vmatpush1.bf16.msra.mxu0 %v1606_v53  ;;  %1188 = vmatpush1.bf16.msra.mxu1 %v1607_v43  ;;  %v1224_v43 = vld [vmem:[#allocation5 + $0x78] sm:$0xff] }
 0x680   :  { %1148 = vmatprep.subr.bf16.mxu0 %v1608_v1  ;;  %1189 = vmatprep.subr.bf16.mxu1 %v1609_v54 }
 0x683   :  { %1149 = vmatpush1.bf16.msra.mxu0 %v1610_v56  ;;  %1190 = vmatpush1.bf16.msra.mxu1 %v1611_v57 }
 0x684   :  { %1150 = vmatprep.subr.bf16.mxu0 %v1612_v58  ;;  %1191 = vmatprep.subr.bf16.mxu1 %v1613_v59 }
 0x687   :  { %1151 = vmatpush1.bf16.msra.mxu0 %v1614_v49  ;;  %1192 = vmatpush1.bf16.msra.mxu1 %v1615_v60  ;;  %v1227_v60 = vunpack.c.l.bf16 %v1224_v43 }
 0x688   :  { %1152 = vmatprep.subr.bf16.mxu0 %v1616_v61  ;;  %1193 = vmatprep.subr.bf16.mxu1 %v1617_v62  ;;  %v1270_v61 = vld [vmem:[#allocation9 + $0x10] sm:$0xff] }
 0x68b   :  { %1153 = vmatpush1.bf16.msra.mxu0 %v1618_v63  ;;  %1194 = vmatpush1.bf16.msra.mxu1 %v1619_v3  ;;  %v1228_v63 = vunpack.c.h.bf16 %v1224_v43 }
 0x68c   :  { %1154 = vmatprep.subr.bf16.mxu0 %v1620_v4  ;;  %1195 = vmatprep.subr.bf16.mxu1 %v1621_v5  ;;  %v1388_v4 = vmul.f32 -1.442695, %v1270_v61 }
 0x68f   :  { %1155 = vmatpush1.bf16.msra.mxu0 %v1622_v6  ;;  %1196 = vmatpush1.bf16.msra.mxu1 %v1623_v8  ;;  %v1271_v8 = vld [vmem:[#allocation9 + $0x18] sm:$0xff] }
 0x745   :  { %v1049_v12 = vpop.f32.mrb[24].mxu0  ;;  %v1090_v13 = vpop.f32.mrb[24].mxu1 }
 0x746   :  { %v1104_v14 = vadd.f32 %v1100_v10, %v1049_v12  ;;  %v1051_v15 = vpop.f32.mrb[25].mxu0  ;;  %v1092_v16 = vpop.f32.mrb[25].mxu1  ;;  %v1106_v27 = vadd.f32 %v1102_v25, %v1090_v13 }
 0x747   :  { %v1105_v18 = vadd.f32 %v1101_v11, %v1051_v15  ;;  %v1053_v19 = vpop.f32.mrb[26].mxu0  ;;  %v1094_v20 = vpop.f32.mrb[26].mxu1  ;;  %v1107_v28 = vadd.f32 %v1103_v26, %v1092_v16 }
 0x748   :  { %v1381_v21 = vmul.f32 -1.442695, %v1104_v14  ;;  %v1054_v22 = vpop.f32.mrb[27].mxu0  ;;  %v1095_v23 = vpop.f32.mrb[27].mxu1  ;;  %v1383_v29 = vmul.f32 -1.442695, %v1106_v27 }
 0x749   :  { %v1382_v24 = vmul.f32 -1.442695, %v1105_v18 }
 0x74a   :  { %1544 = vpow2.f32 %v1381_v21 }
 0x74b   :  { %1546 = vpow2.f32 %v1382_v24 }
 0x74c   :  { %1548 = vtanh.f32 %v1107_v28 }
 0x74d   :  { %1550 = vpow2.f32 %v1383_v29 }
 0x754   :  { %v1545_v30 = vpop.eup %1544 }
 0x755   :  { %v1117_v31 = vadd.f32 1.0, %v1545_v30  ;;  %v1547_v32 = vpop.eup %1546 }
 0x756   :  { %v1118_v33 = vadd.f32 1.0, %v1547_v32  ;;  %v1549_v55 = vpop.eup %1548 }
 0x757   :  { %1552 = vrcp.f32 %v1117_v31  ;;  %v1551_v0 = vpop.eup %1550  ;;  %v1389_v31 = vld [vmem:[%s2122_s3] ss:$0 sm:$0xff] }
 0x758   :  { %1554 = vrcp.f32 %v1118_v33  ;;  %v1119_v39 = vadd.f32 1.0, %v1551_v0 }
 0x75a   :  { %1556 = vrcp.f32 %v1119_v39 }
 0x761   :  { %v1553_v34 = vpop.eup %1552 }
 0x762   :  { %v1128_v35 = vmul.f32 %v1553_v34, %v1549_v55  ;;  %v1555_v38 = vpop.eup %1554  ;;  %v1390_v55 = vld [vmem:[%s2123_s4] ss:$0 sm:$0xff] }
 0x763   :  { %v1127_v40 = vmul.f32 %v1555_v38, %v2104_v37  ;;  %v1391_v38 = vld [vmem:[#allocation4] ss:$0 sm:$0xff] }
 0x764   :  { %v1557_v42 = vpop.eup %1556 }
 0x765   :  { %v1129_v41 = vadd.f32 %v1128_v35, %v1127_v40 }
 0x767   :  { %1558 = vtanh.f32 %v1129_v41 }
 0x768   :  { %1560 = vpow2.f32 %v1387_v46 }
 0x771   :  { %v1559_v44 = vpop.eup %1558 }
 0x772   :  { %v1131_v45 = vmul.f32 %v1559_v44, %v1557_v42  ;;  %v1561_v62 = vpop.eup %1560 }
 0x773   :  { %v1278_v5 = vadd.f32 1.0, %v1561_v62 }
 0x774   :  { %v1139_v2 = vpack.c.bf16 %v1131_v45, %v1131_v45 }
 0x776   :  { %1173 = vmatmul.mubr.bf16.vlgmr.msra.gmra.mrb[28].mxu0 %v1139_v2  ;;  %1214 = vmatmul.mubr.bf16.vlgmr.msra.gmra.mrb[28].mxu1 %v1139_v2 }
 0x849   :  { %v1174_v50 = vpop.f32.mrb[28].mxu0  ;;  %v1215_v51 = vpop.f32.mrb[28].mxu1 }
 0x84a   :  { %v1229_v52 = vadd.f32 %v1225_v36, %v1174_v50  ;;  %v1176_v53 = vpop.f32.mrb[29].mxu0  ;;  %v1217_v37 = vpop.f32.mrb[29].mxu1  ;;  %v1231_v3 = vadd.f32 %v1227_v60, %v1215_v51 }
 0x84b   :  { %v1230_v1 = vadd.f32 %v1226_v48, %v1176_v53  ;;  %v1178_v54 = vpop.f32.mrb[30].mxu0  ;;  %v1219_v56 = vpop.f32.mrb[30].mxu1  ;;  %v1232_v6 = vadd.f32 %v1228_v63, %v1217_v37 }
 0x84c   :  { %v1384_v57 = vmul.f32 -1.442695, %v1229_v52  ;;  %v1179_v58 = vpop.f32.mrb[31].mxu0  ;;  %v1220_v59 = vpop.f32.mrb[31].mxu1  ;;  %v1386_v9 = vmul.f32 -1.442695, %v1231_v3 }
 0x84d   :  { %v1385_v49 = vmul.f32 -1.442695, %v1230_v1 }
 0x84e   :  { %1562 = vpow2.f32 %v1384_v57 }
 0x84f   :  { %1564 = vpow2.f32 %v1385_v49 }
 0x850   :  { %1566 = vpow2.f32 %v1388_v4 }
 0x851   :  { %1568 = vrcp.f32 %v1278_v5 }
 0x852   :  { %1570 = vtanh.f32 %v1271_v8 }
 0x853   :  { %1572 = vtanh.f32 %v1232_v6 }
 0x854   :  { %1574 = vpow2.f32 %v1386_v9 }
 0x858   :  { %v1563_v10 = vpop.eup %1562 }
 0x859   :  { %v1242_v11 = vadd.f32 1.0, %v1563_v10  ;;  %v1565_v12 = vpop.eup %1564 }
 0x85a   :  { %v1243_v13 = vadd.f32 1.0, %v1565_v12  ;;  %v1567_v14 = vpop.eup %1566 }
 0x85b   :  { %1576 = vrcp.f32 %v1242_v11  ;;  %v1569_v15 = vpop.eup %1568  ;;  %v1279_v20 = vadd.f32 1.0, %v1567_v14 }
 0x85c   :  { %1578 = vrcp.f32 %v1243_v13  ;;  %v1571_v16 = vpop.eup %1570 }
 0x85d   :  { %v1573_v17 = vpop.eup %1572  ;;  %v1285_v22 = vmul.f32 %v1571_v16, %v1569_v15  ;;  %1580 = vrcp.f32 %v1279_v20 }
 0x85e   :  { %v1575_v18 = vpop.eup %1574 }
 0x85f   :  { %v1244_v24 = vadd.f32 1.0, %v1575_v18  ;;  %1582 = vtanh.f32 %v1285_v22 }
 0x861   :  { %1584 = vrcp.f32 %v1244_v24 }
 0x865   :  { %v1577_v19 = vpop.eup %1576 }
 0x866   :  { %v1253_v21 = vmul.f32 %v1577_v19, %v1573_v17  ;;  %v1579_v23 = vpop.eup %1578 }
 0x867   :  { %v1252_v25 = vmul.f32 %v1579_v23, %v1129_v41  ;;  %v1581_v27 = vpop.eup %1580 }
 0x869   :  { %v1254_v26 = vadd.f32 %v1253_v21, %v1252_v25  ;;  %v1583_v28 = vpop.eup %1582 }
 0x86a   :  { %v1287_v33 = vmul.f32 %v1583_v28, %v1581_v27 }
 0x86b   :  { %1586 = vtanh.f32 %v1254_v26  ;;  %v1585_v29 = vpop.eup %1584 }
 0x86c   :  { %v1305_v34 = vmul.f32 %v1390_v55, %v1287_v33 }
 0x875   :  { %v1587_v30 = vpop.eup %1586 }
 0x876   :  { %v1256_v32 = vmul.f32 %v1587_v30, %v1585_v29 }
 0x878   :  { %v1295_v0 = vmul.f32 %v1389_v31, %v1256_v32 }
 0x87a   :  { %1296 = vadd.xlane.f32.xlu0 %v1295_v0 }
 0x87e   :  { %1306 = vadd.xlane.f32.xlu0 %v1305_v34 }
 0x907   :  { %v1297_v35 = vpop.xlane.xlu0 %1296 }
 0x90b   :  { %v1307_v39 = vpop.xlane.xlu0 %1306 }
 0x90c   :  { %v1308_v40 = vadd.f32 %v1307_v39, %v1297_v35 }
 0x90e   :  { %v1316_v41 = vadd.f32 %v1391_v38, %v1308_v40 }
 0x910   :  { %v1392_v42 = vmul.f32 -1.442695, %v1316_v41 }
 0x912   :  { %1588 = vpow2.f32 %v1392_v42 }
 0x91c   :  { %v1589_v44 = vpop.eup %1588 }
 0x91d   :  { %v1320_v45 = vadd.f32 1.0, %v1589_v44 }
 0x91f   :  { %1590 = vrcp.f32 %v1320_v45 }
 0x929   :  { %v1591_v2 = vpop.eup %1590 }
 0x92a   :  { %1324 = vst.msk [vmem:[%s2125_s6] sm:$0xff] %vm1323_vm0, %v1591_v2 }
 0x92b   :  { %1329 = vsyncpa [#allocation6], 1 }
 0x92c   :  { %1330 = vsyncpa [#allocation8], 1 }

</bundles_post_ra>
